<compile_context>
chip_gen: v7x
topology: tpu7x:2x2x1
jax: 0.10.0
libtpu: 0.0.40
codegen_flags: <defaults>
</compile_context>

<pallas_src>
import functools

import jax
import jax.numpy as jnp
from jax import lax
from jax.experimental import pallas as pl
from jax.experimental.pallas import tpu as pltpu


def _round_up(x, m):
    return (x + m - 1) // m * m


def _vq_kernel(x_ref, wT_ref, w_ref, w2_ref, *out_refs,
               n_total, k_chunk, emit_dist):
    """One N-tile of the VQ forward; codebook axis processed in k_chunk slabs.

    x_ref:   (tile_n, d_pad) f32       flattened-input tile (zero padded)
    wT_ref:  (d_pad, k_pad)  f32/bf16  pre-transposed codebook (resident)
    w_ref:   (k_pad, d_pad)  f32       codebook (resident, for the gather matmul)
    w2_ref:  (1, k_pad)      f32       ||w||^2 per code (+1e30 on padded codes)
    outputs (dist is optional, controlled by emit_dist):
      dist_ref:  (tile_n, k_pad)       squared distances
      idx_ref:   (1, 1, tile_n) int32  argmin indices (lane-dense)
      quant_ref: (tile_n, d_pad) f32   quantized vectors
      sqerr_ref: (1, 1, 128)    f32    per-tile sum((quant - x)^2)
      counts_ref:(1, 1, k_pad)  f32    per-tile code-usage counts
    """
    if emit_dist:
        dist_ref, idx_ref, quant_ref, sqerr_ref, counts_ref = out_refs
    else:
        idx_ref, quant_ref, sqerr_ref, counts_ref = out_refs

    tile_n = x_ref.shape[0]
    k_pad = w_ref.shape[0]
    n_chunks = k_pad // k_chunk

    x = x_ref[...]                                              # (tile_n, d_pad)
    x2 = jnp.sum(x * x, axis=1, keepdims=True)                  # (tile_n, 1)
    # factor 2 of the distance matmul folded into the small operand; optional
    # bf16 cast follows wT's dtype (no-op when wT is f32).
    xm = (x * 2.0).astype(wT_ref.dtype)

    # ---- pass 1: chunked distances + running (min, argmin) -----------------
    best_d = jnp.full((tile_n, 1), jnp.inf, dtype=jnp.float32)
    best_i = jnp.zeros((tile_n, 1), dtype=jnp.int32)
    for c in range(n_chunks):
        lo, hi = c * k_chunk, (c + 1) * k_chunk
        xw2 = jnp.dot(xm, wT_ref[:, lo:hi],
                      preferred_element_type=jnp.float32)       # MXU
        dist_c = x2 + w2_ref[:, lo:hi] - xw2                    # (tile_n, k_chunk)
        if emit_dist:
            dist_ref[:, lo:hi] = dist_c.astype(dist_ref.dtype)
        col = lax.broadcasted_iota(jnp.int32, dist_c.shape, 1) + lo
        min_c = jnp.min(dist_c, axis=1, keepdims=True)
        # torch-style first-index tie break within the chunk
        idx_c = jnp.min(jnp.where(dist_c == min_c, col, k_pad),
                        axis=1, keepdims=True)
        take = min_c < best_d          # strict <: earlier chunk wins on ties
        best_i = jnp.where(take, idx_c, best_i)
        best_d = jnp.where(take, min_c, best_d)

    idx_ref[...] = best_i[:, 0][None, None, :].astype(jnp.int32)  # lane-dense

    # padding rows beyond the real N must not contribute to the reductions
    row0 = pl.program_id(0) * tile_n
    valid_row = (lax.broadcasted_iota(jnp.int32, (1, tile_n), 1) + row0
                 < n_total).astype(jnp.float32)                  # (1, tile_n)
    valid_col = (lax.broadcasted_iota(jnp.int32, (tile_n, 1), 0) + row0
                 < n_total).astype(jnp.float32)                  # (tile_n, 1)

    # ---- pass 2: chunked one-hot gather + MXU counts ------------------------
    quant_ref[...] = jnp.zeros_like(quant_ref)
    for c in range(n_chunks):
        lo, hi = c * k_chunk, (c + 1) * k_chunk
        col = lax.broadcasted_iota(jnp.int32, (tile_n, k_chunk), 1) + lo
        onehot_c = (col == best_i).astype(jnp.float32)           # (tile_n, k_chunk)
        quant_ref[...] += jnp.dot(onehot_c, w_ref[lo:hi, :],
                                  preferred_element_type=jnp.float32)
        # counts on the MXU; padding-row mask folded in for free
        counts_c = jnp.dot(valid_row, onehot_c,
                           preferred_element_type=jnp.float32)   # (1, k_chunk)
        counts_ref[:, :, lo:hi] = counts_c[None]

    quant = quant_ref[...]
    diff = quant - x
    sq = jnp.sum(jnp.sum(diff * diff * valid_col, axis=1, keepdims=True),
                 axis=0, keepdims=True)                          # (1, 1)
    sqerr_ref[...] = jnp.broadcast_to(sq, sqerr_ref.shape)       # (1, 1, 128)


def vector_quantizer_forward(inputs, embedding_weight, commitment_cost, *,
                             tile_n=512,
                             return_distances=True,
                             return_encodings=True,
                             distances_dtype=jnp.float32,
                             use_bf16_matmul=False):
    """inputs: (batch, embedding_dim, time) f32. embedding_weight: (K, D) f32."""
    B, D, T = inputs.shape
    K, D_w = embedding_weight.shape
    assert D_w == D

    # Reproduce: inputs.permute(1, 2, 0).contiguous().view(-1, D)
    x_perm = jnp.transpose(inputs, (1, 2, 0))            # (D, T, B)
    input_shape = x_perm.shape
    flat = x_perm.reshape(-1, D).astype(jnp.float32)     # (N, D), N = T * B
    N = flat.shape[0]

    d_pad = _round_up(D, 128)
    k_pad = _round_up(K, 128)

    # codebook chunk width: largest multiple of 128 <= 512 that divides k_pad
    k_chunk = 128
    for cand in (512, 384, 256, 128):
        if k_pad % cand == 0:
            k_chunk = cand
            break

    dist_bytes = jnp.dtype(distances_dtype).itemsize if return_distances else 0

    def _footprint(tn):
        io = (2 * tn * d_pad * 4                      # x input tile (2-buffered)
              + 2 * tn * k_pad * dist_bytes           # distances out (2-buffered, optional)
              + 2 * tn * d_pad * 4                    # quantized out (2-buffered)
              + 2 * (tn + 128 + k_pad) * 4)           # idx / sqerr / counts outs
        resident = 2 * (2 * k_pad * d_pad * 4 + k_pad * 4)   # w, w^T, ||w||^2 (default 2-buf)
        temps = 6 * tn * k_chunk * 4 + 2 * tn * d_pad * 4    # in-kernel live temporaries
        return io + resident + temps

    # Per-generation VMEM budget: derived from physical capacity
    # (v5e/v6e: 128 MiB -> ~48 MiB budget; v7x: 64 MiB/TC -> ~32 MiB budget).
    try:
        vmem_cap = int(getattr(pltpu.get_tpu_info(), "vmem_capacity_bytes",
                               64 << 20))
    except Exception:
        vmem_cap = 64 << 20
    budget = max(16 << 20, min(vmem_cap // 2, 48 << 20))

    # tile_n: floor 128, multiples of 128 (MXU-friendly, unmasked lane stores)
    tile_n = max(128, _round_up(min(tile_n, max(N, 1)), 128))
    while tile_n > 128 and _footprint(tile_n) > budget:
        tile_n = max(128, _round_up(tile_n // 2, 128))

    n_pad = _round_up(max(N, 1), tile_n)
    n_tiles = n_pad // tile_n

    # Pad only when needed (jnp.pad always copies).  Padded codes are masked
    # out of the argmin by a +1e30 bias on their ||w||^2 term.
    if (n_pad, d_pad) != (N, D):
        x_pad = jnp.pad(flat, ((0, n_pad - N), (0, d_pad - D)))
    else:
        x_pad = flat
    w_f32 = embedding_weight.astype(jnp.float32)
    if (k_pad, d_pad) != (K, D):
        w_pad = jnp.pad(w_f32, ((0, k_pad - K), (0, d_pad - D)))
    else:
        w_pad = w_f32
    wT_pad = w_pad.T                                     # (d_pad, k_pad) for the distance matmul
    if use_bf16_matmul:
        wT_pad = wT_pad.astype(jnp.bfloat16)
    w2 = jnp.sum(w_pad * w_pad, axis=1)
    w2 = jnp.where(jnp.arange(k_pad) < K, w2, jnp.float32(1e30))
    w2_pad = w2[None, :]                                 # (1, k_pad)

    out_shapes = []
    out_specs = []
    if return_distances:
        out_shapes.append(jax.ShapeDtypeStruct((n_pad, k_pad), distances_dtype))
        out_specs.append(pl.BlockSpec((tile_n, k_pad), lambda i: (i, 0)))
    out_shapes += [
        jax.ShapeDtypeStruct((n_tiles, 1, tile_n), jnp.int32),   # encoding indices
        jax.ShapeDtypeStruct((n_pad, d_pad), jnp.float32),       # quantized (flat)
        jax.ShapeDtypeStruct((n_tiles, 1, 128), jnp.float32),    # per-tile sq-err sums
        jax.ShapeDtypeStruct((n_tiles, 1, k_pad), jnp.float32),  # per-tile code counts
    ]
    out_specs += [
        pl.BlockSpec((1, 1, tile_n), lambda i: (i, 0, 0)),
        pl.BlockSpec((tile_n, d_pad), lambda i: (i, 0)),
        pl.BlockSpec((1, 1, 128), lambda i: (i, 0, 0)),
        pl.BlockSpec((1, 1, k_pad), lambda i: (i, 0, 0)),
    ]

    grid_spec = pltpu.PrefetchScalarGridSpec(
        num_scalar_prefetch=0,
        grid=(n_tiles,),
        in_specs=[
            pl.BlockSpec((tile_n, d_pad), lambda i: (i, 0)),
            pl.BlockSpec((d_pad, k_pad), lambda i: (0, 0)),      # resident codebook^T
            pl.BlockSpec((k_pad, d_pad), lambda i: (0, 0)),      # resident codebook
            pl.BlockSpec((1, k_pad), lambda i: (0, 0)),          # resident ||w||^2
        ],
        out_specs=tuple(out_specs),
    )

    # Clamp the scoped-VMEM limit per generation (<= 3/4 of physical VMEM, so
    # it never exceeds v7x's 64 MiB per-TC capacity).
    vmem_limit = int(min(max(_footprint(tile_n) + (4 << 20), 32 << 20),
                         vmem_cap * 3 // 4))

    kernel = functools.partial(_vq_kernel, n_total=N, k_chunk=k_chunk,
                               emit_dist=return_distances)
    outs = pl.pallas_call(
        kernel,
        out_shape=tuple(out_shapes),
        grid_spec=grid_spec,
        compiler_params=pltpu.CompilerParams(
            dimension_semantics=("parallel",),      # no cross-tile accumulators
            vmem_limit_bytes=vmem_limit),
    )(x_pad, wT_pad, w_pad, w2_pad)

    if return_distances:
        dist_p, idx_p, quant_p, sqerr_p, counts_p = outs
    else:
        idx_p, quant_p, sqerr_p, counts_p = outs
        dist_p = None

    # ---- tiny final reductions / reshapes in plain JAX ----
    idx_flat = idx_p.reshape(-1)[:N]                              # (N,)
    quant_flat = quant_p[:N, :D]                                  # (N, D)

    # MSE over the (D, T, B) view == mean over the flat (N, D) elements.
    mse = jnp.sum(sqerr_p[:, 0, 0]) / jnp.float32(N * D)

    counts = jnp.sum(counts_p[:, 0, :K], axis=0)                  # (K,)
    avg_probs = counts / jnp.float32(N)
    perplexity = jnp.exp(-jnp.sum(avg_probs * jnp.log(avg_probs + 1e-10)))

    # one-hot only re-materialized when requested (saves N*K*4 B HBM write)
    encodings = (jax.nn.one_hot(idx_flat, K, dtype=jnp.float32)
                 if return_encodings else None)

    e_latent_loss = mse            # forward value identical regardless of detach side
    q_latent_loss = mse
    commitment_loss = commitment_cost * e_latent_loss
    vq_loss = q_latent_loss + commitment_loss

    # quantized.view(input_shape) then permute(2, 0, 1) -> (batch, D, time)
    quantized = jnp.transpose(quant_flat.reshape(input_shape), (2, 0, 1))

    distances = (dist_p[:N, :K].reshape(B, T, K) if return_distances else None)

    return {
        'vq_loss': vq_loss,
        'quantized': quantized.astype(inputs.dtype),
        'perplexity': perplexity,
        'encodings': (encodings.reshape(B, T, K) if return_encodings else None),
        'distances': distances,
        'encoding_indices': idx_flat[:, None],
        # jnp scalars (not Python floats) so this wrapper stays jit-compatible
        'losses': {
            'e_latent_loss': e_latent_loss,
            'q_latent_loss': q_latent_loss,
            'commitment_loss': commitment_loss,
            'vq_loss': vq_loss,
        },
        'encoding_distances': None,
        'embedding_distances': None,
        'frames_vs_embedding_distances': None,
        'concatenated_quantized': None,
    }


if __name__ == "__main__":
    key = jax.random.PRNGKey(0)
    k_in, k_emb = jax.random.split(key)

    batch, embedding_dim, time = 2, 8, 16
    num_embeddings = 16
    commitment_cost = 0.25

    # layout: (batch, embedding_dim, time)
    inputs = jax.random.normal(k_in, (batch, embedding_dim, time), dtype=jnp.float32)
    # nn.Embedding weight init: uniform(-1/K, 1/K)
    embedding_weight = jax.random.uniform(
        k_emb, (num_embeddings, embedding_dim), dtype=jnp.float32,
        minval=-1.0 / num_embeddings, maxval=1.0 / num_embeddings)

    out = vector_quantizer_forward(inputs, embedding_weight, commitment_cost)
    jax.block_until_ready(out['quantized'])
    jax.block_until_ready(out['vq_loss'])
    jax.block_until_ready(out['perplexity'])

    # sanity: shapes implied by the PyTorch forward
    assert out['quantized'].shape == (batch, embedding_dim, time)
    assert out['encodings'].shape == (batch, time, num_embeddings)
    assert out['distances'].shape == (batch, time, num_embeddings)
    assert out['encoding_indices'].shape == (time * batch, 1)
    p = float(out['perplexity'])
    assert 1.0 - 1e-3 <= p <= num_embeddings + 1e-3
    assert bool(jnp.isfinite(out['vq_loss']))

    # cross-check quantized against a plain-JAX reference of the torch math
    flat_ref = jnp.transpose(inputs, (1, 2, 0)).reshape(-1, embedding_dim)
    d_ref = (jnp.sum(flat_ref**2, 1, keepdims=True)
             + jnp.sum(embedding_weight**2, 1)
             - 2.0 * flat_ref @ embedding_weight.T)
    idx_ref = jnp.argmin(d_ref, axis=1)
    q_ref = jnp.transpose(
        embedding_weight[idx_ref].reshape(embedding_dim, time, batch), (2, 0, 1))
    assert bool(jnp.all(out['encoding_indices'][:, 0] == idx_ref))
    assert float(jnp.max(jnp.abs(out['quantized'] - q_ref))) < 1e-5

    print("KERNEL_OK")
</pallas_src>

<mosaic_0001>
module attributes {stable_mosaic.version = 11 : i64} {
  func.func @_vq_kernel(%arg0: i32, %arg1: memref<128x128xf32, #tpu.memory_space<vmem>>, %arg2: memref<128x128xf32, #tpu.memory_space<vmem>>, %arg3: memref<128x128xf32, #tpu.memory_space<vmem>>, %arg4: memref<1x128xf32, #tpu.memory_space<vmem>>, %arg5: memref<128x128xf32, #tpu.memory_space<vmem>>, %arg6: memref<1x1x128xi32, #tpu.memory_space<vmem>>, %arg7: memref<128x128xf32, #tpu.memory_space<vmem>>, %arg8: memref<1x1x128xf32, #tpu.memory_space<vmem>>, %arg9: memref<1x1x128xf32, #tpu.memory_space<vmem>>) attributes {dimension_semantics = [#tpu.dimension_semantics<parallel>], iteration_bounds = array<i64: 1>, scalar_prefetch = 0 : i64, scratch_operands = 0 : i64, tpu.core_type = #tpu.core_type<tc>, window_params = [{transform_indices = @transform_0, window_bounds = array<i64: 128, 128>}, {pipeline_mode = #tpu.pipeline_mode<synchronous>, transform_indices = @transform_1, window_bounds = array<i64: 128, 128>}, {pipeline_mode = #tpu.pipeline_mode<synchronous>, transform_indices = @transform_2, window_bounds = array<i64: 128, 128>}, {pipeline_mode = #tpu.pipeline_mode<synchronous>, transform_indices = @transform_3, window_bounds = array<i64: 1, 128>}, {transform_indices = @transform_4, window_bounds = array<i64: 128, 128>}, {transform_indices = @transform_5, window_bounds = array<i64: 1, 1, 128>}, {transform_indices = @transform_6, window_bounds = array<i64: 128, 128>}, {transform_indices = @transform_7, window_bounds = array<i64: 1, 1, 128>}, {transform_indices = @transform_8, window_bounds = array<i64: 1, 1, 128>}]} {
    %c0 = arith.constant 0 : index
    %c0_0 = arith.constant 0 : index
    %0 = vector.load %arg1[%c0, %c0_0] : memref<128x128xf32, #tpu.memory_space<vmem>>, vector<128x128xf32>
    %1 = arith.mulf %0, %0 : vector<128x128xf32>
    %cst = arith.constant dense<0.000000e+00> : vector<128xf32>
    %2 = vector.multi_reduction <add>, %1, %cst [1] : vector<128x128xf32> to vector<128xf32>
    %3 = vector.shape_cast %2 : vector<128xf32> to vector<128x1xf32>
    %cst_1 = arith.constant 2.000000e+00 : f32
    %4 = vector.broadcast %cst_1 : f32 to vector<128x128xf32>
    %5 = arith.mulf %0, %4 : vector<128x128xf32>
    %cst_2 = arith.constant 0x7F800000 : f32
    %6 = vector.broadcast %cst_2 : f32 to vector<128x1xf32>
    %c0_i32 = arith.constant 0 : i32
    %7 = vector.broadcast %c0_i32 : i32 to vector<128x1xi32>
    %c0_3 = arith.constant 0 : index
    %c0_4 = arith.constant 0 : index
    %8 = vector.load %arg2[%c0_3, %c0_4] : memref<128x128xf32, #tpu.memory_space<vmem>>, vector<128x128xf32>
    %cst_5 = arith.constant dense<0.000000e+00> : vector<128x128xf32>
    %9 = tpu.matmul %5, %8, %cst_5 {dimension_numbers = #tpu.dot_dimension_numbers<[1], [0], [0], [1], [0, 0, 1, 1], [], []>} : vector<128x128xf32>, vector<128x128xf32>, vector<128x128xf32> -> vector<128x128xf32>
    %c0_6 = arith.constant 0 : index
    %c0_7 = arith.constant 0 : index
    %10 = vector.load %arg4[%c0_6, %c0_7] : memref<1x128xf32, #tpu.memory_space<vmem>>, vector<1x128xf32>
    %11 = vector.broadcast %3 : vector<128x1xf32> to vector<128x128xf32>
    %12 = vector.broadcast %10 : vector<1x128xf32> to vector<128x128xf32>
    %13 = arith.addf %11, %12 : vector<128x128xf32>
    %14 = arith.subf %13, %9 : vector<128x128xf32>
    %c0_8 = arith.constant 0 : index
    %c0_9 = arith.constant 0 : index
    %15 = vector.load %arg5[%c0_8, %c0_9] : memref<128x128xf32, #tpu.memory_space<vmem>>, vector<128x128xf32>
    tpu.vector_store %arg5[%c0_8, %c0_9], %14 {strides = array<i32>} : memref<128x128xf32, #tpu.memory_space<vmem>>, vector<128x128xf32>,
    %16 = tpu.iota {dimensions = array<i32: 1>} : vector<128x128xi32>
    %c0_i32_10 = arith.constant 0 : i32
    %17 = vector.broadcast %c0_i32_10 : i32 to vector<128x128xi32>
    %18 = arith.addi %16, %17 : vector<128x128xi32>
    %cst_11 = arith.constant dense<0x7F800000> : vector<128xf32>
    %19 = vector.multi_reduction <minimumf>, %14, %cst_11 [1] : vector<128x128xf32> to vector<128xf32>
    %20 = vector.shape_cast %19 : vector<128xf32> to vector<128x1xf32>
    %21 = vector.broadcast %20 : vector<128x1xf32> to vector<128x128xf32>
    %22 = arith.cmpf oeq, %14, %21 : vector<128x128xf32>
    %c128_i32 = arith.constant 128 : i32
    %23 = vector.broadcast %c128_i32 : i32 to vector<128x128xi32>
    %24 = arith.select %22, %18, %23 : vector<128x128xi1>, vector<128x128xi32>
    %cst_12 = arith.constant dense<2147483647> : vector<128xi32>
    %25 = vector.multi_reduction <minsi>, %24, %cst_12 [1] : vector<128x128xi32> to vector<128xi32>
    %26 = vector.shape_cast %25 : vector<128xi32> to vector<128x1xi32>
    %27 = arith.cmpf olt, %20, %6 : vector<128x1xf32>
    %28 = arith.select %27, %26, %7 : vector<128x1xi1>, vector<128x1xi32>
    %29 = vector.shape_cast %28 : vector<128x1xi32> to vector<128xi32>
    %30 = vector.shape_cast %29 : vector<128xi32> to vector<1x1x128xi32>
    %c0_13 = arith.constant 0 : index
    %c0_14 = arith.constant 0 : index
    %c0_15 = arith.constant 0 : index
    %31 = vector.load %arg6[%c0_13, %c0_14, %c0_15] : memref<1x1x128xi32, #tpu.memory_space<vmem>>, vector<1x1x128xi32>
    tpu.vector_store %arg6[%c0_13, %c0_14, %c0_15], %30 {strides = array<i32>} : memref<1x1x128xi32, #tpu.memory_space<vmem>>, vector<1x1x128xi32>,
    %c128_i32_16 = arith.constant 128 : i32
    %32 = arith.muli %arg0, %c128_i32_16 : i32
    %33 = tpu.iota {dimensions = array<i32: 1>} : vector<1x128xi32>
    %34 = vector.broadcast %32 : i32 to vector<1x128xi32>
    %35 = arith.addi %33, %34 : vector<1x128xi32>
    %c32_i32 = arith.constant 32 : i32
    %36 = vector.broadcast %c32_i32 : i32 to vector<1x128xi32>
    %37 = arith.cmpi slt, %35, %36 : vector<1x128xi32>
    %38 = arith.extui %37 : vector<1x128xi1> to vector<1x128xi32>
    %39 = arith.sitofp %38 : vector<1x128xi32> to vector<1x128xf32>
    %40 = tpu.iota {dimensions = array<i32: 0>} : vector<128x1xi32>
    %41 = vector.broadcast %32 : i32 to vector<128x1xi32>
    %42 = arith.addi %40, %41 : vector<128x1xi32>
    %c32_i32_17 = arith.constant 32 : i32
    %43 = vector.broadcast %c32_i32_17 : i32 to vector<128x1xi32>
    %44 = arith.cmpi slt, %42, %43 : vector<128x1xi32>
    %45 = arith.extui %44 : vector<128x1xi1> to vector<128x1xi32>
    %46 = arith.sitofp %45 : vector<128x1xi32> to vector<128x1xf32>
    %cst_18 = arith.constant 0.000000e+00 : f32
    %47 = vector.broadcast %cst_18 : f32 to vector<128x128xf32>
    %c0_19 = arith.constant 0 : index
    %c0_20 = arith.constant 0 : index
    %48 = vector.load %arg7[%c0_19, %c0_20] : memref<128x128xf32, #tpu.memory_space<vmem>>, vector<128x128xf32>
    tpu.vector_store %arg7[%c0_19, %c0_20], %47 {strides = array<i32>} : memref<128x128xf32, #tpu.memory_space<vmem>>, vector<128x128xf32>,
    %49 = tpu.iota {dimensions = array<i32: 1>} : vector<128x128xi32>
    %c0_i32_21 = arith.constant 0 : i32
    %50 = vector.broadcast %c0_i32_21 : i32 to vector<128x128xi32>
    %51 = arith.addi %49, %50 : vector<128x128xi32>
    %52 = vector.broadcast %28 : vector<128x1xi32> to vector<128x128xi32>
    %53 = arith.cmpi eq, %51, %52 : vector<128x128xi32>
    %54 = arith.extui %53 : vector<128x128xi1> to vector<128x128xi32>
    %55 = arith.sitofp %54 : vector<128x128xi32> to vector<128x128xf32>
    %c0_22 = arith.constant 0 : index
    %c0_23 = arith.constant 0 : index
    %56 = vector.load %arg7[%c0_22, %c0_23] : memref<128x128xf32, #tpu.memory_space<vmem>>, vector<128x128xf32>
    %c0_24 = arith.constant 0 : index
    %c0_25 = arith.constant 0 : index
    %57 = vector.load %arg3[%c0_24, %c0_25] : memref<128x128xf32, #tpu.memory_space<vmem>>, vector<128x128xf32>
    %cst_26 = arith.constant dense<0.000000e+00> : vector<128x128xf32>
    %58 = tpu.matmul %55, %57, %cst_26 {dimension_numbers = #tpu.dot_dimension_numbers<[1], [0], [0], [1], [0, 0, 1, 1], [], []>} : vector<128x128xf32>, vector<128x128xf32>, vector<128x128xf32> -> vector<128x128xf32>
    %59 = arith.addf %56, %58 : vector<128x128xf32>
    %c0_27 = arith.constant 0 : index
    %c0_28 = arith.constant 0 : index
    %60 = vector.load %arg7[%c0_27, %c0_28] : memref<128x128xf32, #tpu.memory_space<vmem>>, vector<128x128xf32>
    tpu.vector_store %arg7[%c0_27, %c0_28], %59 {strides = array<i32>} : memref<128x128xf32, #tpu.memory_space<vmem>>, vector<128x128xf32>,
    %cst_29 = arith.constant dense<0.000000e+00> : vector<1x128xf32>
    %61 = tpu.matmul %39, %55, %cst_29 {dimension_numbers = #tpu.dot_dimension_numbers<[1], [0], [0], [1], [0, 0, 1, 1], [], []>} : vector<1x128xf32>, vector<128x128xf32>, vector<1x128xf32> -> vector<1x128xf32>
    %62 = vector.shape_cast %61 : vector<1x128xf32> to vector<1x1x128xf32>
    %c0_30 = arith.constant 0 : index
    %c0_31 = arith.constant 0 : index
    %c0_32 = arith.constant 0 : index
    %63 = vector.load %arg9[%c0_30, %c0_31, %c0_32] : memref<1x1x128xf32, #tpu.memory_space<vmem>>, vector<1x1x128xf32>
    tpu.vector_store %arg9[%c0_30, %c0_31, %c0_32], %62 {strides = array<i32>} : memref<1x1x128xf32, #tpu.memory_space<vmem>>, vector<1x1x128xf32>,
    %c0_33 = arith.constant 0 : index
    %c0_34 = arith.constant 0 : index
    %64 = vector.load %arg7[%c0_33, %c0_34] : memref<128x128xf32, #tpu.memory_space<vmem>>, vector<128x128xf32>
    %65 = arith.subf %64, %0 : vector<128x128xf32>
    %66 = arith.mulf %65, %65 : vector<128x128xf32>
    %67 = vector.broadcast %46 : vector<128x1xf32> to vector<128x128xf32>
    %68 = arith.mulf %66, %67 : vector<128x128xf32>
    %cst_35 = arith.constant dense<0.000000e+00> : vector<128xf32>
    %69 = vector.multi_reduction <add>, %68, %cst_35 [1] : vector<128x128xf32> to vector<128xf32>
    %70 = vector.shape_cast %69 : vector<128xf32> to vector<128x1xf32>
    %cst_36 = arith.constant dense<0.000000e+00> : vector<1xf32>
    %71 = vector.multi_reduction <add>, %70, %cst_36 [0] : vector<128x1xf32> to vector<1xf32>
    %72 = vector.shape_cast %71 : vector<1xf32> to vector<1x1xf32>
    %73 = vector.shape_cast %72 : vector<1x1xf32> to vector<1x1x1xf32>
    %74 = vector.broadcast %73 : vector<1x1x1xf32> to vector<1x1x128xf32>
    %c0_37 = arith.constant 0 : index
    %c0_38 = arith.constant 0 : index
    %c0_39 = arith.constant 0 : index
    %75 = vector.load %arg8[%c0_37, %c0_38, %c0_39] : memref<1x1x128xf32, #tpu.memory_space<vmem>>, vector<1x1x128xf32>
    tpu.vector_store %arg8[%c0_37, %c0_38, %c0_39], %74 {strides = array<i32>} : memref<1x1x128xf32, #tpu.memory_space<vmem>>, vector<1x1x128xf32>,
    return
  }
  func.func @transform_0(%arg0: i32) -> (i32, i32) {
    %c0_i32 = arith.constant 0 : i32
    %c0_i32_0 = arith.constant 0 : i32
    return %arg0, %c0_i32 : i32, i32
  }
  func.func @transform_1(%arg0: i32) -> (i32, i32) {
    %c0_i32 = arith.constant 0 : i32
    %c0_i32_0 = arith.constant 0 : i32
    %c0_i32_1 = arith.constant 0 : i32
    return %c0_i32, %c0_i32_0 : i32, i32
  }
  func.func @transform_2(%arg0: i32) -> (i32, i32) {
    %c0_i32 = arith.constant 0 : i32
    %c0_i32_0 = arith.constant 0 : i32
    %c0_i32_1 = arith.constant 0 : i32
    return %c0_i32, %c0_i32_0 : i32, i32
  }
  func.func @transform_3(%arg0: i32) -> (i32, i32) {
    %c0_i32 = arith.constant 0 : i32
    %c0_i32_0 = arith.constant 0 : i32
    %c0_i32_1 = arith.constant 0 : i32
    return %c0_i32, %c0_i32_0 : i32, i32
  }
  func.func @transform_4(%arg0: i32) -> (i32, i32) {
    %c0_i32 = arith.constant 0 : i32
    %c0_i32_0 = arith.constant 0 : i32
    return %arg0, %c0_i32 : i32, i32
  }
  func.func @transform_5(%arg0: i32) -> (i32, i32, i32) {
    %c0_i32 = arith.constant 0 : i32
    %c0_i32_0 = arith.constant 0 : i32
    %c0_i32_1 = arith.constant 0 : i32
    return %arg0, %c0_i32, %c0_i32_0 : i32, i32, i32
  }
  func.func @transform_6(%arg0: i32) -> (i32, i32) {
    %c0_i32 = arith.constant 0 : i32
    %c0_i32_0 = arith.constant 0 : i32
    return %arg0, %c0_i32 : i32, i32
  }
  func.func @transform_7(%arg0: i32) -> (i32, i32, i32) {
    %c0_i32 = arith.constant 0 : i32
    %c0_i32_0 = arith.constant 0 : i32
    %c0_i32_1 = arith.constant 0 : i32
    return %arg0, %c0_i32, %c0_i32_0 : i32, i32, i32
  }
  func.func @transform_8(%arg0: i32) -> (i32, i32, i32) {
    %c0_i32 = arith.constant 0 : i32
    %c0_i32_0 = arith.constant 0 : i32
    %c0_i32_1 = arith.constant 0 : i32
    return %arg0, %c0_i32, %c0_i32_0 : i32, i32, i32
  }
}

</mosaic_0001>

<bundles_post_ra>
// kernel: tpu_custom_call.1
= control target key start
LH: loop header
LB: loop body
LE: loop exit
PB: predicated region body
PF: predicated region fallthrough
CT: control target
= control target key end

     0   :  { %14 = vsyncpa [#allocation3], 0  ;;  %s2788_s0 = inlined_call_operand.hbm [shape: f32[128,128], index: 0, kind: input, shape index: {}]   ;;  %s2789_s1 = inlined_call_operand.hbm [shape: f32[128,128], index: 1, kind: input, shape index: {}]   ;;  %s2790_s2 = inlined_call_operand.hbm [shape: f32[128,128], index: 2, kind: input, shape index: {}]   ;;  %s2791_s3 = inlined_call_operand.vmem [shape: f32[1,128], index: 3, kind: input, shape index: {}]   ;;  %s2792_s4 = inlined_call_operand.hbm [shape: f32[128,128], index: 4, kind: output, shape index: {0}]   ;;  %s2793_s5 = inlined_call_operand.hbm [shape: s32[1,1,128], index: 5, kind: output, shape index: {1}]   ;;  %s2794_s6 = inlined_call_operand.hbm [shape: f32[128,128], index: 6, kind: output, shape index: {2}]   ;;  %s2795_s7 = inlined_call_operand.hbm [shape: f32[1,1,128], index: 7, kind: output, shape index: {3}]   ;;  %s2796_s8 = inlined_call_operand.hbm [shape: f32[1,1,128], index: 8, kind: output, shape index: {4}]  }
   0x1   :  { %15 = vsyncpa [#allocation6], 0 }
   0x2   :  { %16 = vsyncpa [#allocation4], 0 }
   0x3   :  { %17 = vsyncpa [#allocation10], 0 }
   0x4   :  { %18 = vsyncpa [#allocation13], 0  ;;  %s2001_s27 = smov [#allocation5]   ;;  %s2002_s29 = smov [#allocation2]  }
   0x5   :  { %s36_s28 = sshll.u32 %s2001_s27, 4  ;;  %s24_s30 = sshll.u32 %s2002_s29, 4  ;;  %s37_s28 = int_to_ptr.vmem [resolvable:$true] %s36_s28  ;;  %s2061_s30 = int_to_ptr.vmem [resolvable:$true] %s24_s30 }
   0x6   :  { %s1815_s11 = scalar_lea.hbm %s2789_s1, 2048 }
   0x7   :  { %p1816_p0 = scmp.ne.s32.totalorder %s2789_s1, %s1815_s11  ;;  %p1819_p1 = scmp.lt.u32.totalorder %s1815_s11, %s2789_s1 }
   0x9   :  { %p1821_p2 = pnand %p1819_p1, %p1816_p0 }
   0xb   :  { %1824 = shalt.err (!%p1821_p2)
}
   0xc   :  { %s1825_s16 = scalar_lea.vmem %s37_s28, 2048  ;;  %p1830_p4 = scmp.lt.s32.totalorder %s37_s28, %s37_s28 }
   0xd   :  { %p1826_p3 = scmp.ne.s32.totalorder %s37_s28, %s1825_s16  ;;  %p1831_p5 = scmp.lt.s32.totalorder %s1825_s16, %s1825_s16 }
   0xf   :  { %p1832_p6 = por %p1831_p5, %p1830_p4 }
  0x11   :  { %p1833_p7 = pnand %p1832_p6, %p1826_p3 }
  0x13   :  { %1836 = shalt.err (!%p1833_p7)
}
  0x14   :  { %s2003_s17 = smov 128   ;;  %s2004_s18 = smov 8  }
  0x15   :  { %42 = dma.hbm_to_vmem [thread:$0]  %s2789_s1, 2048, %s37_s28, [#allocation6], %s2003_s17, %s2003_s17, %s2004_s18  }
  0x16   :  { %s1837_s23 = scalar_lea.hbm %s2788_s0, 2048 }
  0x17   :  { %p1838_p8 = scmp.ne.s32.totalorder %s2788_s0, %s1837_s23  ;;  %p1841_p9 = scmp.lt.u32.totalorder %s1837_s23, %s2788_s0 }
  0x19   :  { %p1843_p10 = pnand %p1841_p9, %p1838_p8 }
  0x1b   :  { %1846 = shalt.err (!%p1843_p10)
}
  0x1c   :  { %s1847_s29 = scalar_lea.vmem %s2061_s30, 2048  ;;  %p1852_p12 = scmp.lt.s32.totalorder %s2061_s30, %s2061_s30 }
  0x1d   :  { %p1848_p11 = scmp.ne.s32.totalorder %s2061_s30, %s1847_s29  ;;  %p1853_p13 = scmp.lt.s32.totalorder %s1847_s29, %s1847_s29 }
  0x1f   :  { %p1854_p0 = por %p1853_p13, %p1852_p12 }
  0x21   :  { %p1855_p1 = pnand %p1854_p0, %p1848_p11 }
  0x23   :  { %1858 = shalt.err (!%p1855_p1)
}
  0x24   :  { %30 = dma.hbm_to_vmem [thread:$0]  %s2788_s0, 2048, %s2061_s30, [#allocation3], %s2003_s17, %s2003_s17, %s2004_s18  }
  0x25   :  { %s2005_s9 = smov [#allocation7]   ;;  %s1859_s13 = scalar_lea.hbm %s2790_s2, 2048 }
  0x26   :  { %s48_s10 = sshll.u32 %s2005_s9, 4  ;;  %p1860_p2 = scmp.ne.s32.totalorder %s2790_s2, %s1859_s13  ;;  %s49_s10 = int_to_ptr.vmem [resolvable:$true] %s48_s10 }
  0x27   :  { %p1863_p3 = scmp.lt.u32.totalorder %s1859_s13, %s2790_s2 }
  0x29   :  { %p1865_p4 = pnand %p1863_p3, %p1860_p2 }
  0x2b   :  { %1868 = shalt.err (!%p1865_p4)
}
  0x2c   :  { %s1869_s20 = scalar_lea.vmem %s49_s10, 2048  ;;  %p1874_p6 = scmp.lt.s32.totalorder %s49_s10, %s49_s10 }
  0x2d   :  { %p1870_p5 = scmp.ne.s32.totalorder %s49_s10, %s1869_s20  ;;  %p1875_p7 = scmp.lt.s32.totalorder %s1869_s20, %s1869_s20 }
  0x2f   :  { %p1876_p8 = por %p1875_p7, %p1874_p6 }
  0x31   :  { %p1877_p9 = pnand %p1876_p8, %p1870_p5 }
  0x33   :  { %1880 = shalt.err (!%p1877_p9)
}
  0x34   :  { %54 = dma.hbm_to_vmem [thread:$0]  %s2790_s2, 2048, %s49_s10, [#allocation6], %s2003_s17, %s2003_s17, %s2004_s18  }
  0x35   :  { %1991 = dma.done.wait [#allocation3], 2048  }
  0x36   :  { %1992 = vsyncadd [#allocation3], 4294965248 }
  0x37   :  { %1993 = dma.done.wait [#allocation6], 4096  }
  0x38   :  { %1994 = vsyncadd [#allocation6], 4294963200  ;;  %v146_v0 = vld [vmem:[#allocation5] sm:$0xff]  ;;  %v147_v1 = vld [vmem:[#allocation5 + $0x8] sm:$0xff] }
  0x39   :  { %v148_v2 = vld [vmem:[#allocation5 + $0x10] sm:$0xff]  ;;  %v1696_v3 = vpack.c.bf16 %v147_v1, %v146_v0  ;;  %v149_v4 = vld [vmem:[#allocation5 + $0x18] sm:$0xff]  ;;  %v150_v6 = vld [vmem:[#allocation5 + $0x20] sm:$0xff] }
  0x3a   :  { %v1700_v5 = vpack.c.bf16 %v149_v4, %v148_v2  ;;  %v151_v7 = vld [vmem:[#allocation5 + $0x28] sm:$0xff]  ;;  %v66_v9 = vld [vmem:[#allocation2] sm:$0xff]  ;;  %v152_v10 = vld [vmem:[#allocation5 + $0x30] sm:$0xff] }
  0x3b   :  { %1697 = vmatprep.subr.bf16.mxu0 %v1696_v3  ;;  %v1704_v8 = vpack.c.bf16 %v151_v7, %v150_v6  ;;  %v153_v11 = vld [vmem:[#allocation5 + $0x38] sm:$0xff]  ;;  %v130_v12 = vmul.f32 2.0, %v66_v9  ;;  %v2113_v13 = vld [vmem:[#allocation2 + $0x10] sm:$0xff]  ;;  %v82_v14 = vmul.f32 %v66_v9, %v66_v9  ;;  %v67_v16 = vld [vmem:[#allocation2 + $0x8] sm:$0xff] }
  0x3c   :  { %1699 = vmatpush3.bf16.msra.mxu0 %v1696_v3  ;;  %v84_v15 = vmul.f32 %v2113_v13, %v2113_v13  ;;  %v1708_v17 = vpack.c.bf16 %v153_v11, %v152_v10  ;;  %v2117_v18 = vld [vmem:[#allocation2 + $0x18] sm:$0xff]  ;;  %v83_v19 = vmul.f32 %v67_v16, %v67_v16  ;;  %v154_v20 = vld [vmem:[#allocation5 + $0x40] sm:$0xff]  ;;  %v155_v21 = vld [vmem:[#allocation5 + $0x48] sm:$0xff]  ;;  %v131_v53 = vmul.f32 2.0, %v67_v16 }
  0x3d   :  { %1701 = vmatprep.subr.bf16.mxu0 %v1700_v5  ;;  %1581 = vmatprep.mubr.f32.mxu0 %v130_v12  ;;  %v85_v22 = vmul.f32 %v2117_v18, %v2117_v18  ;;  %v70_v23 = vld [vmem:[#allocation2 + $0x20] sm:$0xff]  ;;  %v1712_v24 = vpack.c.bf16 %v155_v21, %v154_v20  ;;  %v71_v25 = vld [vmem:[#allocation2 + $0x28] sm:$0xff]  ;;  %v156_v27 = vld [vmem:[#allocation5 + $0x50] sm:$0xff]  ;;  %v132_v54 = vmul.f32 2.0, %v2113_v13  ;;  %v133_v59 = vmul.f32 2.0, %v2117_v18 }
  0x3e   :  { %98 = vadd.xlane.f32.xlu0 %v82_v14  ;;  %102 = vadd.xlane.f32.xlu1 %v84_v15  ;;  %v86_v26 = vmul.f32 %v70_v23, %v70_v23  ;;  %v157_v28 = vld [vmem:[#allocation5 + $0x58] sm:$0xff]  ;;  %v87_v29 = vmul.f32 %v71_v25, %v71_v25  ;;  %v72_v30 = vld [vmem:[#allocation2 + $0x30] sm:$0xff]  ;;  %v158_v34 = vld [vmem:[#allocation5 + $0x60] sm:$0xff]  ;;  %v134_v60 = vmul.f32 2.0, %v70_v23  ;;  %v135_v61 = vmul.f32 2.0, %v71_v25 }
  0x3f   :  { %v1716_v31 = vpack.c.bf16 %v157_v28, %v156_v27  ;;  %v73_v32 = vld [vmem:[#allocation2 + $0x38] sm:$0xff]  ;;  %v88_v33 = vmul.f32 %v72_v30, %v72_v30  ;;  %v159_v35 = vld [vmem:[#allocation5 + $0x68] sm:$0xff]  ;;  %v74_v37 = vld [vmem:[#allocation2 + $0x40] sm:$0xff]  ;;  %v136_v62 = vmul.f32 2.0, %v72_v30 }
  0x40   :  { %1703 = vmatpush3.bf16.msra.mxu0 %v1700_v5  ;;  %v89_v36 = vmul.f32 %v73_v32, %v73_v32  ;;  %v1720_v38 = vpack.c.bf16 %v159_v35, %v158_v34  ;;  %v75_v39 = vld [vmem:[#allocation2 + $0x48] sm:$0xff]  ;;  %v90_v40 = vmul.f32 %v74_v37, %v74_v37  ;;  %v160_v41 = vld [vmem:[#allocation5 + $0x70] sm:$0xff]  ;;  %v161_v42 = vld [vmem:[#allocation5 + $0x78] sm:$0xff]  ;;  %v137_v63 = vmul.f32 2.0, %v73_v32 }
  0x41   :  { %1705 = vmatprep.subr.bf16.mxu0 %v1704_v8  ;;  %v91_v43 = vmul.f32 %v75_v39, %v75_v39  ;;  %v76_v44 = vld [vmem:[#allocation2 + $0x50] sm:$0xff]  ;;  %v1724_v45 = vpack.c.bf16 %v161_v42, %v160_v41  ;;  %v77_v46 = vld [vmem:[#allocation2 + $0x58] sm:$0xff]  ;;  %v78_v49 = vld [vmem:[#allocation2 + $0x60] sm:$0xff]  ;;  %v138_v0 = vmul.f32 2.0, %v74_v37  ;;  %v139_v1 = vmul.f32 2.0, %v75_v39 }
  0x42   :  { %100 = vadd.xlane.f32.xlu0 %v83_v19  ;;  %104 = vadd.xlane.f32.xlu1 %v85_v22  ;;  %v92_v47 = vmul.f32 %v76_v44, %v76_v44  ;;  %v93_v48 = vmul.f32 %v77_v46, %v77_v46  ;;  %v79_v50 = vld [vmem:[#allocation2 + $0x68] sm:$0xff]  ;;  %v94_v51 = vmul.f32 %v78_v49, %v78_v49  ;;  %v80_v55 = vld [vmem:[#allocation2 + $0x70] sm:$0xff]  ;;  %v81_v56 = vld [vmem:[#allocation2 + $0x78] sm:$0xff]  ;;  %v140_v2 = vmul.f32 2.0, %v76_v44 }
  0x43   :  { %v95_v52 = vmul.f32 %v79_v50, %v79_v50  ;;  %v96_v57 = vmul.f32 %v80_v55, %v80_v55  ;;  %v97_v58 = vmul.f32 %v81_v56, %v81_v56  ;;  %v141_v3 = vmul.f32 2.0, %v77_v46  ;;  %v2126_v14 = vld [vmem:[%s2791_s3] ss:$0 sm:$0xff]  ;;  %s2011_s3 = smov [#allocation9]  }
  0x44   :  { %1707 = vmatpush3.bf16.msra.mxu0 %v1704_v8  ;;  %v142_v4 = vmul.f32 2.0, %v78_v49  ;;  %v143_v5 = vmul.f32 2.0, %v79_v50  ;;  %v144_v6 = vmul.f32 2.0, %v80_v55  ;;  %v145_v7 = vmul.f32 2.0, %v81_v56  ;;  %s1361_s22 = sshll.u32 %s2011_s3, 4  ;;  %s1362_s22 = int_to_ptr.vmem [resolvable:$true] %s1361_s22 }
  0x45   :  { %1709 = vmatprep.subr.bf16.mxu0 %v1708_v17  ;;  %s1881_s23 = scalar_lea.vmem %s1362_s22, 16  ;;  %s1885_s24 = scalar_lea.vmem %s1362_s22, 32 }
  0x46   :  { %106 = vadd.xlane.f32.xlu0 %v86_v26  ;;  %108 = vadd.xlane.f32.xlu1 %v87_v29  ;;  %p1882_p10 = scmp.ne.s32.totalorder %s1362_s22, %s1881_s23  ;;  %p1886_p11 = scmp.lt.s32.totalorder %s1362_s22, %s1362_s22 }
  0x47   :  { %p1887_p12 = scmp.lt.s32.totalorder %s1885_s24, %s1881_s23 }
  0x48   :  { %1711 = vmatpush3.bf16.msra.mxu0 %v1708_v17 }
  0x49   :  { %1713 = vmatprep.subr.bf16.mxu0 %v1712_v24  ;;  %p1888_p13 = por %p1887_p12, %p1886_p11 }
  0x4a   :  { %110 = vadd.xlane.f32.xlu0 %v88_v33  ;;  %112 = vadd.xlane.f32.xlu1 %v89_v36 }
  0x4b   :  { %p1889_p0 = pnand %p1888_p13, %p1882_p10 }
  0x4c   :  { %1715 = vmatpush3.bf16.msra.mxu0 %v1712_v24 }
  0x4d   :  { %1717 = vmatprep.subr.bf16.mxu0 %v1716_v31 }
  0x4e   :  { %114 = vadd.xlane.f32.xlu0 %v90_v40  ;;  %116 = vadd.xlane.f32.xlu1 %v91_v43 }
  0x50   :  { %1719 = vmatpush3.bf16.msra.mxu0 %v1716_v31 }
  0x51   :  { %1721 = vmatprep.subr.bf16.mxu0 %v1720_v38 }
  0x52   :  { %118 = vadd.xlane.f32.xlu0 %v92_v47  ;;  %120 = vadd.xlane.f32.xlu1 %v93_v48 }
  0x54   :  { %1723 = vmatpush3.bf16.msra.mxu0 %v1720_v38 }
  0x55   :  { %1725 = vmatprep.subr.bf16.mxu0 %v1724_v45 }
  0x56   :  { %122 = vadd.xlane.f32.xlu0 %v94_v51  ;;  %124 = vadd.xlane.f32.xlu1 %v95_v52 }
  0x58   :  { %1727 = vmatpush3.bf16.msra.mxu0 %v1724_v45 }
  0x5a   :  { %126 = vadd.xlane.f32.xlu0 %v96_v57  ;;  %128 = vadd.xlane.f32.xlu1 %v97_v58 }
  0x5b   :  { %1582 = vmatmul.mubr.f32.vlgmr.msra.gmra.mrb[0].mxu0 %v131_v53 }
  0x5c   :  { %1584 = vmatprep.mubr.f32.mxu0 %v132_v54 }
  0x5f   :  { %1585 = vmatmul.mubr.f32.gmra.mrb[2].mxu0 %v133_v59 }
  0x60   :  { %1587 = vmatprep.mubr.f32.mxu0 %v134_v60 }
  0x63   :  { %1588 = vmatmul.mubr.f32.gmra.mrb[4].mxu0 %v135_v61 }
  0x64   :  { %1590 = vmatprep.mubr.f32.mxu0 %v136_v62 }
  0x67   :  { %1591 = vmatmul.mubr.f32.gmra.mrb[6].mxu0 %v137_v63 }
  0x68   :  { %1593 = vmatprep.mubr.f32.mxu0 %v138_v0 }
  0x6b   :  { %1594 = vmatmul.mubr.f32.gmra.mrb[8].mxu0 %v139_v1 }
  0x6c   :  { %1596 = vmatprep.mubr.f32.mxu0 %v140_v2 }
  0x6f   :  { %1597 = vmatmul.mubr.f32.gmra.mrb[10].mxu0 %v141_v3 }
  0x70   :  { %1599 = vmatprep.mubr.f32.mxu0 %v142_v4 }
  0x73   :  { %1600 = vmatmul.mubr.f32.gmra.mrb[12].mxu0 %v143_v5 }
  0x74   :  { %1602 = vmatprep.mubr.f32.mxu0 %v144_v6 }
  0x77   :  { %1603 = vmatmul.mubr.f32.gmra.mrb[14].mxu0 %v145_v7 }
  0xcb   :  { %v103_v8 = vpop.xlane.xlu1 %102  ;;  %v99_v9 = vpop.xlane.xlu0 %98 }
  0xcc   :  { %v314_v18 = vadd.f32 %v2126_v14, %v99_v9  ;;  %v316_v24 = vadd.f32 %v2126_v14, %v103_v8  ;;  %v2797_v9 = vlaneseq }
  0xcf   :  { %v105_v10 = vpop.xlane.xlu1 %104  ;;  %v101_v11 = vpop.xlane.xlu0 %100 }
  0xd0   :  { %v315_v15 = vadd.f32 %v2126_v14, %v101_v11  ;;  %v317_v22 = vadd.f32 %v2126_v14, %v105_v10  ;;  %v2209_v10 = vand.u32 127, %v2797_v9 }
  0xd3   :  { %v109_v12 = vpop.xlane.xlu1 %108  ;;  %v107_v13 = vpop.xlane.xlu0 %106 }
  0xd4   :  { %v319_v29 = vadd.f32 %v2126_v14, %v109_v12  ;;  %v318_v32 = vadd.f32 %v2126_v14, %v107_v13 }
  0xd7   :  { %v113_v16 = vpop.xlane.xlu1 %112  ;;  %v111_v17 = vpop.xlane.xlu0 %110 }
  0xd8   :  { %v321_v36 = vadd.f32 %v2126_v14, %v113_v16  ;;  %v320_v38 = vadd.f32 %v2126_v14, %v111_v17 }
  0xdb   :  { %v117_v26 = vpop.xlane.xlu1 %116  ;;  %v115_v30 = vpop.xlane.xlu0 %114 }
  0xdc   :  { %v323_v44 = vadd.f32 %v2126_v14, %v117_v26  ;;  %v322_v46 = vadd.f32 %v2126_v14, %v115_v30 }
  0xdf   :  { %v121_v39 = vpop.xlane.xlu1 %120  ;;  %v119_v40 = vpop.xlane.xlu0 %118 }
  0xe0   :  { %v325_v51 = vadd.f32 %v2126_v14, %v121_v39  ;;  %v324_v54 = vadd.f32 %v2126_v14, %v119_v40 }
  0xe3   :  { %v125_v48 = vpop.xlane.xlu1 %124  ;;  %v123_v52 = vpop.xlane.xlu0 %122 }
  0xe4   :  { %v327_v58 = vadd.f32 %v2126_v14, %v125_v48  ;;  %v326_v60 = vadd.f32 %v2126_v14, %v123_v52 }
  0xe7   :  { %v129_v61 = vpop.xlane.xlu1 %128  ;;  %v127_v62 = vpop.xlane.xlu0 %126 }
  0xe8   :  { %v329_v2 = vadd.f32 %v2126_v14, %v129_v61  ;;  %v328_v4 = vadd.f32 %v2126_v14, %v127_v62 }
 0x12e   :  { %v1583_v19 = vpop.f32.mrb[0].mxu0 }
 0x12f   :  { %v2130_v20 = vsub.f32 %v315_v15, %v1583_v19  ;;  %v228_v21 = vpop.f32.mrb[1].mxu0 }
 0x130   :  { %v2133_v23 = vsub.f32 %v314_v18, %v228_v21 }
 0x131   :  { %347 = vst [vmem:[#allocation8 + $0x8] sm:$0xff] %v2130_v20  ;;  %366 = vmin.xlane.f32.xlu1 %v2130_v20 }
 0x132   :  { %346 = vst [vmem:[#allocation8] sm:$0xff] %v2133_v23  ;;  %v1586_v25 = vpop.f32.mrb[2].mxu0  ;;  %364 = vmin.xlane.f32.xlu0 %v2133_v23 }
 0x133   :  { %v2140_v27 = vsub.f32 %v317_v22, %v1586_v25  ;;  %v238_v28 = vpop.f32.mrb[3].mxu0 }
 0x134   :  { %v2143_v31 = vsub.f32 %v316_v24, %v238_v28 }
 0x135   :  { %349 = vst [vmem:[#allocation8 + $0x18] sm:$0xff] %v2140_v27  ;;  %370 = vmin.xlane.f32.xlu1 %v2140_v27 }
 0x136   :  { %348 = vst [vmem:[#allocation8 + $0x10] sm:$0xff] %v2143_v31  ;;  %v1589_v33 = vpop.f32.mrb[4].mxu0  ;;  %368 = vmin.xlane.f32.xlu0 %v2143_v31 }
 0x137   :  { %v2150_v34 = vsub.f32 %v319_v29, %v1589_v33  ;;  %v248_v35 = vpop.f32.mrb[5].mxu0 }
 0x138   :  { %v2153_v37 = vsub.f32 %v318_v32, %v248_v35 }
 0x139   :  { %351 = vst [vmem:[#allocation8 + $0x28] sm:$0xff] %v2150_v34  ;;  %374 = vmin.xlane.f32.xlu1 %v2150_v34 }
 0x13a   :  { %350 = vst [vmem:[#allocation8 + $0x20] sm:$0xff] %v2153_v37  ;;  %v1592_v41 = vpop.f32.mrb[6].mxu0  ;;  %372 = vmin.xlane.f32.xlu0 %v2153_v37 }
 0x13b   :  { %v2160_v42 = vsub.f32 %v321_v36, %v1592_v41  ;;  %v258_v43 = vpop.f32.mrb[7].mxu0 }
 0x13c   :  { %v2163_v45 = vsub.f32 %v320_v38, %v258_v43 }
 0x13d   :  { %353 = vst [vmem:[#allocation8 + $0x38] sm:$0xff] %v2160_v42  ;;  %378 = vmin.xlane.f32.xlu1 %v2160_v42 }
 0x13e   :  { %352 = vst [vmem:[#allocation8 + $0x30] sm:$0xff] %v2163_v45  ;;  %v1595_v47 = vpop.f32.mrb[8].mxu0  ;;  %376 = vmin.xlane.f32.xlu0 %v2163_v45 }
 0x13f   :  { %v2170_v49 = vsub.f32 %v323_v44, %v1595_v47  ;;  %v268_v50 = vpop.f32.mrb[9].mxu0 }
 0x140   :  { %v2173_v53 = vsub.f32 %v322_v46, %v268_v50 }
 0x141   :  { %355 = vst [vmem:[#allocation8 + $0x48] sm:$0xff] %v2170_v49  ;;  %382 = vmin.xlane.f32.xlu1 %v2170_v49 }
 0x142   :  { %354 = vst [vmem:[#allocation8 + $0x40] sm:$0xff] %v2173_v53  ;;  %v1598_v55 = vpop.f32.mrb[10].mxu0  ;;  %380 = vmin.xlane.f32.xlu0 %v2173_v53 }
 0x143   :  { %v2180_v56 = vsub.f32 %v325_v51, %v1598_v55  ;;  %v278_v57 = vpop.f32.mrb[11].mxu0 }
 0x144   :  { %v2183_v59 = vsub.f32 %v324_v54, %v278_v57 }
 0x145   :  { %357 = vst [vmem:[#allocation8 + $0x58] sm:$0xff] %v2180_v56  ;;  %386 = vmin.xlane.f32.xlu1 %v2180_v56 }
 0x146   :  { %356 = vst [vmem:[#allocation8 + $0x50] sm:$0xff] %v2183_v59  ;;  %v1601_v63 = vpop.f32.mrb[12].mxu0  ;;  %384 = vmin.xlane.f32.xlu0 %v2183_v59 }
 0x147   :  { %v2190_v0 = vsub.f32 %v327_v58, %v1601_v63  ;;  %v288_v1 = vpop.f32.mrb[13].mxu0 }
 0x148   :  { %v2193_v3 = vsub.f32 %v326_v60, %v288_v1 }
 0x149   :  { %359 = vst [vmem:[#allocation8 + $0x68] sm:$0xff] %v2190_v0  ;;  %390 = vmin.xlane.f32.xlu1 %v2190_v0 }
 0x14a   :  { %358 = vst [vmem:[#allocation8 + $0x60] sm:$0xff] %v2193_v3  ;;  %v1604_v5 = vpop.f32.mrb[14].mxu0  ;;  %388 = vmin.xlane.f32.xlu0 %v2193_v3 }
 0x14b   :  { %v2200_v6 = vsub.f32 %v329_v2, %v1604_v5  ;;  %v298_v7 = vpop.f32.mrb[15].mxu0 }
 0x14c   :  { %v2202_v8 = vsub.f32 %v328_v4, %v298_v7 }
 0x14d   :  { %361 = vst [vmem:[#allocation8 + $0x78] sm:$0xff] %v2200_v6  ;;  %394 = vmin.xlane.f32.xlu1 %v2200_v6 }
 0x14e   :  { %360 = vst [vmem:[#allocation8 + $0x70] sm:$0xff] %v2202_v8  ;;  %392 = vmin.xlane.f32.xlu0 %v2202_v8 }
 0x1be   :  { %v2211_v11 = vpop.xlane.xlu1 %366 }
 0x1bf   :  { %vm397_vm0 = vcmp.eq.f32.partialorder %v2130_v20, %v2211_v11  ;;  %v2215_v12 = vpop.xlane.xlu0 %364 }
 0x1c0   :  { %v2218_v13 = vsel %vm397_vm0, %v2209_v10, 128  ;;  %vm396_vm1 = vcmp.eq.f32.partialorder %v2133_v23, %v2215_v12 }
 0x1c1   :  { %v2223_v14 = vsel %vm396_vm1, %v2209_v10, 128  ;;  %v443_v15 = vshra.s32 %v2218_v13, 16 }
 0x1c2   :  { %v2226_v16 = vpop.xlane.xlu1 %370  ;;  %v429_v17 = vshra.s32 %v2223_v14, 16 }
 0x1c3   :  { %vm399_vm2 = vcmp.eq.f32.partialorder %v2140_v27, %v2226_v16  ;;  %v2231_v18 = vpop.xlane.xlu0 %368  ;;  %v2233_v19 = vcvt.s32.f32 %v443_v15 }
 0x1c4   :  { %v2236_v20 = vsel %vm399_vm2, %v2209_v10, 128  ;;  %vm398_vm3 = vcmp.eq.f32.partialorder %v2143_v31, %v2231_v18  ;;  %v2240_v21 = vcvt.s32.f32 %v429_v17 }
 0x1c5   :  { %v2243_v22 = vsel %vm398_vm3, %v2209_v10, 128  ;;  %446 = vmin.xlane.f32.xlu1 %v2233_v19  ;;  %v471_v23 = vshra.s32 %v2236_v20, 16 }
 0x1c6   :  { %v2247_v24 = vpop.xlane.xlu1 %374  ;;  %432 = vmin.xlane.f32.xlu0 %v2240_v21  ;;  %v457_v25 = vshra.s32 %v2243_v22, 16 }
 0x1c7   :  { %vm401_vm4 = vcmp.eq.f32.partialorder %v2150_v34, %v2247_v24  ;;  %v2253_v26 = vpop.xlane.xlu0 %372  ;;  %v2255_v27 = vcvt.s32.f32 %v471_v23 }
 0x1c8   :  { %v2258_v28 = vsel %vm401_vm4, %v2209_v10, 128  ;;  %vm400_vm5 = vcmp.eq.f32.partialorder %v2153_v37, %v2253_v26  ;;  %v2262_v29 = vcvt.s32.f32 %v457_v25  ;;  %v962_v25 = vld [vmem:[#allocation7 + $0x8] sm:$0xff] }
 0x1c9   :  { %v2265_v30 = vsel %vm400_vm5, %v2209_v10, 128  ;;  %474 = vmin.xlane.f32.xlu1 %v2255_v27  ;;  %v499_v31 = vshra.s32 %v2258_v28, 16 }
 0x1ca   :  { %v2269_v32 = vpop.xlane.xlu1 %378  ;;  %460 = vmin.xlane.f32.xlu0 %v2262_v29  ;;  %v485_v33 = vshra.s32 %v2265_v30, 16 }
 0x1cb   :  { %vm403_vm6 = vcmp.eq.f32.partialorder %v2160_v42, %v2269_v32  ;;  %v2275_v34 = vpop.xlane.xlu0 %376  ;;  %v2277_v35 = vcvt.s32.f32 %v499_v31  ;;  %v963_v31 = vld [vmem:[#allocation7 + $0x10] sm:$0xff] }
 0x1cc   :  { %v2280_v36 = vsel %vm403_vm6, %v2209_v10, 128  ;;  %vm402_vm7 = vcmp.eq.f32.partialorder %v2163_v45, %v2275_v34  ;;  %v2284_v37 = vcvt.s32.f32 %v485_v33 }
 0x1cd   :  { %v2287_v38 = vsel %vm402_vm7, %v2209_v10, 128  ;;  %502 = vmin.xlane.f32.xlu1 %v2277_v35  ;;  %v527_v39 = vshra.s32 %v2280_v36, 16 }
 0x1ce   :  { %v2291_v40 = vpop.xlane.xlu1 %382  ;;  %488 = vmin.xlane.f32.xlu0 %v2284_v37  ;;  %v513_v41 = vshra.s32 %v2287_v38, 16 }
 0x1cf   :  { %vm405_vm8 = vcmp.eq.f32.partialorder %v2170_v49, %v2291_v40  ;;  %v2297_v42 = vpop.xlane.xlu0 %380  ;;  %v2299_v43 = vcvt.s32.f32 %v527_v39  ;;  %v964_v39 = vld [vmem:[#allocation7 + $0x18] sm:$0xff] }
 0x1d0   :  { %v2302_v44 = vsel %vm405_vm8, %v2209_v10, 128  ;;  %vm404_vm9 = vcmp.eq.f32.partialorder %v2173_v53, %v2297_v42  ;;  %v2306_v45 = vcvt.s32.f32 %v513_v41  ;;  %v1732_v41 = vpack.c.bf16 %v964_v39, %v963_v31 }
 0x1d1   :  { %v2309_v46 = vsel %vm404_vm9, %v2209_v10, 128  ;;  %530 = vmin.xlane.f32.xlu1 %v2299_v43  ;;  %v555_v47 = vshra.s32 %v2302_v44, 16  ;;  %v442_v31 = vand.u32 65535, %v2218_v13 }
 0x1d2   :  { %v2313_v48 = vpop.xlane.xlu1 %386  ;;  %516 = vmin.xlane.f32.xlu0 %v2306_v45  ;;  %v541_v49 = vshra.s32 %v2309_v46, 16 }
 0x1d3   :  { %vm407_vm10 = vcmp.eq.f32.partialorder %v2180_v56, %v2313_v48  ;;  %v2319_v50 = vpop.xlane.xlu0 %384  ;;  %v2321_v51 = vcvt.s32.f32 %v555_v47  ;;  %v965_v47 = vld [vmem:[#allocation7 + $0x20] sm:$0xff] }
 0x1d4   :  { %v2324_v52 = vsel %vm407_vm10, %v2209_v10, 128  ;;  %vm406_vm11 = vcmp.eq.f32.partialorder %v2183_v59, %v2319_v50  ;;  %v2328_v53 = vcvt.s32.f32 %v541_v49  ;;  %v966_v49 = vld [vmem:[#allocation7 + $0x28] sm:$0xff] }
 0x1d5   :  { %v2331_v54 = vsel %vm406_vm11, %v2209_v10, 128  ;;  %558 = vmin.xlane.f32.xlu1 %v2321_v51  ;;  %v583_v55 = vshra.s32 %v2324_v52, 16 }
 0x1d6   :  { %v2335_v56 = vpop.xlane.xlu1 %390  ;;  %544 = vmin.xlane.f32.xlu0 %v2328_v53  ;;  %v569_v57 = vshra.s32 %v2331_v54, 16 }
 0x1d7   :  { %vm409_vm12 = vcmp.eq.f32.partialorder %v2190_v0, %v2335_v56  ;;  %v2341_v58 = vpop.xlane.xlu0 %388  ;;  %v2343_v59 = vcvt.s32.f32 %v583_v55  ;;  %v1736_v55 = vpack.c.bf16 %v966_v49, %v965_v47  ;;  %v470_v47 = vand.u32 65535, %v2236_v20 }
 0x1d8   :  { %v2346_v60 = vsel %vm409_vm12, %v2209_v10, 128  ;;  %vm408_vm13 = vcmp.eq.f32.partialorder %v2193_v3, %v2341_v58  ;;  %v2350_v61 = vcvt.s32.f32 %v569_v57  ;;  %v967_v57 = vld [vmem:[#allocation7 + $0x30] sm:$0xff]  ;;  %v498_v20 = vand.u32 65535, %v2258_v28 }
 0x1d9   :  { %v2353_v62 = vsel %vm408_vm13, %v2209_v10, 128  ;;  %586 = vmin.xlane.f32.xlu1 %v2343_v59  ;;  %v611_v63 = vshra.s32 %v2346_v60, 16  ;;  %v526_v28 = vand.u32 65535, %v2280_v36  ;;  %v554_v36 = vand.u32 65535, %v2302_v44 }
 0x1da   :  { %v2357_v0 = vpop.xlane.xlu1 %394  ;;  %572 = vmin.xlane.f32.xlu0 %v2350_v61  ;;  %v597_v1 = vshra.s32 %v2353_v62, 16 }
 0x1db   :  { %vm411_vm14 = vcmp.eq.f32.partialorder %v2200_v6, %v2357_v0  ;;  %v2363_v2 = vpop.xlane.xlu0 %392  ;;  %v2365_v3 = vcvt.s32.f32 %v611_v63  ;;  %v968_v63 = vld [vmem:[#allocation7 + $0x38] sm:$0xff]  ;;  %v556_v44 = vcvt.s32.f32 %v554_v36  ;;  %v2006_v36 = vmov 0.0|0.0  }
 0x1dc   :  { %2799 = vst [vmem:[#allocation20_spill] sm:$0xff] %v2363_v2  ;;  %v2368_v4 = vsel %vm411_vm14, %v2209_v10, 128  ;;  %vm410_vm15 = vcmp.eq.f32.partialorder %v2202_v8, %v2363_v2  ;;  %v2372_v5 = vcvt.s32.f32 %v597_v1  ;;  %v961_v8 = vld [vmem:[#allocation7] sm:$0xff]  ;;  %v1740_v1 = vpack.c.bf16 %v968_v63, %v967_v57  ;;  %v971_v2 = vld [vmem:[#allocation7 + $0x50] sm:$0xff]  ;;  %1760 = vmatprep.subr.bf16.mxu0 %v2006_v36 }
 0x1dd   :  { %v2375_v7 = vsel %vm410_vm15, %v2209_v10, 128  ;;  %614 = vmin.xlane.f32.xlu1 %v2365_v3  ;;  %v639_v15 = vshra.s32 %v2368_v4, 16  ;;  %v1728_v33 = vpack.c.bf16 %v962_v25, %v961_v8  ;;  %v972_v8 = vld [vmem:[#allocation7 + $0x58] sm:$0xff]  ;;  %v472_v57 = vcvt.s32.f32 %v470_v47 }
 0x1de   :  { %600 = vmin.xlane.f32.xlu0 %v2372_v5  ;;  %v625_v6 = vshra.s32 %v2375_v7, 16  ;;  %v1748_v25 = vpack.c.bf16 %v972_v8, %v971_v2  ;;  %v456_v2 = vand.u32 65535, %v2243_v22  ;;  %v484_v22 = vand.u32 65535, %v2265_v30 }
 0x1df   :  { %v2381_v17 = vcvt.s32.f32 %v639_v15  ;;  %1729 = vmatprep.subr.bf16.mxu1 %v1728_v33  ;;  %v969_v15 = vld [vmem:[#allocation7 + $0x40] sm:$0xff]  ;;  %v512_v30 = vand.u32 65535, %v2287_v38  ;;  %v540_v38 = vand.u32 65535, %v2309_v46  ;;  %v568_v46 = vand.u32 65535, %v2331_v54 }
 0x1e0   :  { %v2383_v23 = vcvt.s32.f32 %v625_v6  ;;  %1731 = vmatpush3.bf16.msra.mxu1 %v1728_v33  ;;  %v970_v6 = vld [vmem:[#allocation7 + $0x48] sm:$0xff]  ;;  %v428_v33 = vand.u32 65535, %v2223_v14 }
 0x1e1   :  { %642 = vmin.xlane.f32.xlu1 %v2381_v17  ;;  %1733 = vmatprep.subr.bf16.mxu1 %v1732_v41  ;;  %v1744_v9 = vpack.c.bf16 %v970_v6, %v969_v15  ;;  %v500_v6 = vcvt.s32.f32 %v498_v20  ;;  %v570_v54 = vcvt.s32.f32 %v568_v46 }
 0x1e2   :  { %628 = vmin.xlane.f32.xlu0 %v2383_v23 }
 0x1e4   :  { %1735 = vmatpush3.bf16.msra.mxu1 %v1732_v41  ;;  %v444_v41 = vcvt.s32.f32 %v442_v31 }
 0x1e5   :  { %1737 = vmatprep.subr.bf16.mxu1 %v1736_v55 }
 0x1e8   :  { %1739 = vmatpush3.bf16.msra.mxu1 %v1736_v55  ;;  %v430_v55 = vcvt.s32.f32 %v428_v33  ;;  %v528_v33 = vcvt.s32.f32 %v526_v28 }
 0x1e9   :  { %1741 = vmatprep.subr.bf16.mxu1 %v1740_v1 }
 0x1ec   :  { %1743 = vmatpush3.bf16.msra.mxu1 %v1740_v1 }
 0x1ed   :  { %1745 = vmatprep.subr.bf16.mxu1 %v1744_v9 }
 0x1f0   :  { %1747 = vmatpush3.bf16.msra.mxu1 %v1744_v9 }
 0x1f1   :  { %1749 = vmatprep.subr.bf16.mxu1 %v1748_v25 }
 0x1f4   :  { %1751 = vmatpush3.bf16.msra.mxu1 %v1748_v25 }
 0x252   :  { %v2389_v39 = vpop.xlane.xlu1 %446 }
 0x253   :  { %v2392_v49 = vpop.xlane.xlu0 %432  ;;  %vm448_vm0 = vcmp.eq.f32.partialorder %v2233_v19, %v2389_v39  ;;  %v458_v19 = vcvt.s32.f32 %v456_v2  ;;  %v974_v2 = vld [vmem:[#allocation7 + $0x68] sm:$0xff] }
 0x254   :  { %v449_v9 = vsel %vm448_vm0, %v444_v41, inf  ;;  %vm434_vm1 = vcmp.eq.f32.partialorder %v2240_v21, %v2392_v49  ;;  %vm2007_vm0 = vmmov 0  }
 0x255   :  { %450 = vmin.xlane.f32.xlu1 %v449_v9  ;;  %v435_v13 = vsel %vm434_vm1, %v430_v55, inf  ;;  %v973_v55 = vld [vmem:[#allocation7 + $0x60] sm:$0xff]  ;;  %vm653_vm1 = vcmp.lt.f32.partialorder %v2211_v11, inf }
 0x256   :  { %v2399_v14 = vpop.xlane.xlu1 %474  ;;  %436 = vmin.xlane.f32.xlu0 %v435_v13  ;;  %v582_v13 = vand.u32 65535, %v2324_v52 }
 0x257   :  { %v2402_v63 = vpop.xlane.xlu0 %460  ;;  %vm476_vm2 = vcmp.eq.f32.partialorder %v2255_v27, %v2399_v14  ;;  %v486_v27 = vcvt.s32.f32 %v484_v22  ;;  %v975_v22 = vld [vmem:[#allocation7 + $0x70] sm:$0xff] }
 0x258   :  { %v477_v1 = vsel %vm476_vm2, %v472_v57, inf  ;;  %vm462_vm3 = vcmp.eq.f32.partialorder %v2262_v29, %v2402_v63  ;;  %v1752_v57 = vpack.c.bf16 %v974_v2, %v973_v55  ;;  %v453_v55 = vcvt.f32.s32 %v2389_v39 }
 0x259   :  { %478 = vmin.xlane.f32.xlu1 %v477_v1  ;;  %v463_v21 = vsel %vm462_vm3, %v458_v19, inf  ;;  %v976_v1 = vld [vmem:[#allocation7 + $0x78] sm:$0xff]  ;;  %v439_v2 = vcvt.f32.s32 %v2392_v49  ;;  %v2800_v39 = vlaneseq  ;;  %v688_v49 = vadd.s32 4294967288, %v2209_v10 }
 0x25a   :  { %v2409_v15 = vpop.xlane.xlu1 %502  ;;  %464 = vmin.xlane.f32.xlu0 %v463_v21  ;;  %1753 = vmatprep.subr.bf16.mxu1 %v1752_v57  ;;  %v584_v21 = vcvt.s32.f32 %v582_v13  ;;  %v467_v13 = vcvt.f32.s32 %v2402_v63  ;;  %vm652_vm2 = vcmp.lt.f32.partialorder %v2215_v12, inf  ;;  %vm655_vm3 = vcmp.lt.f32.partialorder %v2226_v16, inf }
 0x25b   :  { %v2412_v8 = vpop.xlane.xlu0 %488  ;;  %vm504_vm4 = vcmp.eq.f32.partialorder %v2277_v35, %v2409_v15  ;;  %v514_v35 = vcvt.s32.f32 %v512_v30  ;;  %1755 = vmatpush3.bf16.msra.mxu1 %v1752_v57 }
 0x25c   :  { %v505_v25 = vsel %vm504_vm4, %v500_v6, inf  ;;  %vm490_vm5 = vcmp.eq.f32.partialorder %v2284_v37, %v2412_v8  ;;  %v610_v6 = vand.u32 65535, %v2346_v60  ;;  %v495_v57 = vcvt.f32.s32 %v2412_v8 }
 0x25d   :  { %506 = vmin.xlane.f32.xlu1 %v505_v25  ;;  %v491_v29 = vsel %vm490_vm5, %v486_v27, inf  ;;  %vm693_vm4 = vcmask 130112   ;;  %vm654_vm5 = vcmp.lt.f32.partialorder %v2231_v18, inf }
 0x25e   :  { %v2419_v31 = vpop.xlane.xlu1 %530  ;;  %492 = vmin.xlane.f32.xlu0 %v491_v29  ;;  %v612_v60 = vcvt.s32.f32 %v610_v6  ;;  %v638_v29 = vand.u32 65535, %v2368_v4 }
 0x25f   :  { %v2422_v41 = vpop.xlane.xlu0 %516  ;;  %vm532_vm6 = vcmp.eq.f32.partialorder %v2299_v43, %v2419_v31  ;;  %v542_v43 = vcvt.s32.f32 %v540_v38 }
 0x260   :  { %v533_v47 = vsel %vm532_vm6, %v528_v33, inf  ;;  %vm518_vm7 = vcmp.eq.f32.partialorder %v2306_v45, %v2422_v41  ;;  %v640_v4 = vcvt.s32.f32 %v638_v29  ;;  %v2514_v29 = vadd.s32 4294967256, %v2209_v10 }
 0x261   :  { %534 = vmin.xlane.f32.xlu1 %v533_v47  ;;  %v519_v37 = vsel %vm518_vm7, %v514_v35, inf  ;;  %vm700_vm6 = vcmask 195712   ;;  %vm707_vm7 = vcmask 261312  }
 0x262   :  { %v2429_v9 = vpop.xlane.xlu1 %558  ;;  %520 = vmin.xlane.f32.xlu0 %v519_v37 }
 0x263   :  { %v2432_v20 = vpop.xlane.xlu0 %544  ;;  %vm560_vm8 = vcmp.eq.f32.partialorder %v2321_v51, %v2429_v9  ;;  %v1756_v51 = vpack.c.bf16 %v976_v1, %v975_v22  ;;  %v565_v46 = vcvt.f32.s32 %v2429_v9  ;;  %v2479_v22 = vshrl.u32 %v2800_v39, 7 }
 0x264   :  { %v561_v45 = vsel %vm560_vm8, %v556_v44, inf  ;;  %vm546_vm9 = vcmp.eq.f32.partialorder %v2328_v53, %v2432_v20  ;;  %v596_v53 = vand.u32 65535, %v2353_v62  ;;  %v624_v62 = vand.u32 65535, %v2375_v7 }
 0x265   :  { %562 = vmin.xlane.f32.xlu1 %v561_v45  ;;  %v547_v19 = vsel %vm546_vm9, %v542_v43, inf  ;;  %1757 = vmatprep.subr.bf16.mxu1 %v1756_v51  ;;  %v481_v44 = vcvt.f32.s32 %v2399_v14  ;;  %v523_v43 = vcvt.f32.s32 %v2422_v41  ;;  %v551_v45 = vcvt.f32.s32 %v2432_v20 }
 0x266   :  { %v2439_v52 = vpop.xlane.xlu1 %586  ;;  %548 = vmin.xlane.f32.xlu0 %v547_v19  ;;  %1759 = vmatpush3.bf16.msra.mxu1 %v1756_v51  ;;  %v454_v19 = vshll.u32 %v453_v55, 16  ;;  %v440_v14 = vshll.u32 %v439_v2, 16  ;;  %v2487_v9 = vshll.u32 %v495_v57, 16  ;;  %v719_v55 = vsub.s32 %v2514_v29, %v2479_v22 }
 0x267   :  { %v2442_v28 = vpop.xlane.xlu0 %572  ;;  %vm588_vm10 = vcmp.eq.f32.partialorder %v2343_v59, %v2439_v52  ;;  %v598_v59 = vcvt.s32.f32 %v596_v53  ;;  %v482_v63 = vshll.u32 %v481_v44, 16  ;;  %v2492_v1 = vshll.u32 %v523_v43, 16 }
 0x268   :  { %v589_v27 = vsel %vm588_vm10, %v584_v21, inf  ;;  %vm574_vm11 = vcmp.eq.f32.partialorder %v2350_v61, %v2442_v28  ;;  %v579_v8 = vcvt.f32.s32 %v2442_v28  ;;  %v2494_v21 = vshll.u32 %v565_v46, 16 }
 0x269   :  { %590 = vmin.xlane.f32.xlu1 %v589_v27  ;;  %v575_v30 = vsel %vm574_vm11, %v570_v54, inf  ;;  %v2496_v6 = vshll.u32 %v551_v45, 16  ;;  %v691_v54 = vsub.s32 %v688_v49, %v2479_v22  ;;  %v2505_v53 = vadd.s32 4294967272, %v2209_v10 }
 0x26a   :  { %v2449_v25 = vpop.xlane.xlu1 %614  ;;  %576 = vmin.xlane.f32.xlu0 %v575_v30  ;;  %v2509_v30 = vshll.u32 %v579_v8, 16  ;;  %vm657_vm8 = vcmp.lt.f32.partialorder %v2247_v24, inf  ;;  %vm656_vm9 = vcmp.lt.f32.partialorder %v2253_v26, inf  ;;  %v2547_v45 = vadd.s32 4294967248, %v2209_v10 }
 0x26b   :  { %v2452_v33 = vpop.xlane.xlu0 %600  ;;  %vm616_vm12 = vcmp.eq.f32.partialorder %v2365_v3, %v2449_v25  ;;  %v626_v3 = vcvt.s32.f32 %v624_v62  ;;  %v621_v51 = vcvt.f32.s32 %v2449_v25 }
 0x26c   :  { %v617_v61 = vsel %vm616_vm12, %v612_v60, inf  ;;  %vm602_vm13 = vcmp.eq.f32.partialorder %v2372_v5, %v2452_v33  ;;  %v2008_v5 = vmov 0.0   ;;  %v607_v28 = vcvt.f32.s32 %v2452_v33 }
 0x26d   :  { %618 = vmin.xlane.f32.xlu1 %v617_v61  ;;  %v603_v35 = vsel %vm602_vm13, %v598_v59, inf  ;;  %1693 = vmatprep.mubr.msk.f32.mxu0 %vm2007_vm0, %v2008_v5  ;;  %v686_v60 = vsub.s32 %v2209_v10, %v2479_v22  ;;  %v2519_v59 = vadd.s32 4294967264, %v2209_v10  ;;  %vm714_vm12 = vcmask 326912  }
 0x26e   :  { %v2460_v38 = vpop.xlane.xlu1 %642  ;;  %604 = vmin.xlane.f32.xlu0 %v603_v35  ;;  %vm659_vm13 = vcmp.lt.f32.partialorder %v2269_v32, inf  ;;  %vm658_vm0 = vcmp.lt.f32.partialorder %v2275_v34, inf }
 0x26f   :  { %v2462_v47 = vpop.xlane.xlu0 %628  ;;  %vm644_vm14 = vcmp.eq.f32.partialorder %v2381_v17, %v2460_v38  ;;  %v509_v17 = vcvt.f32.s32 %v2409_v15  ;;  %v593_v15 = vcvt.f32.s32 %v2439_v52  ;;  %v2499_v52 = vadd.s32 4294967280, %v2209_v10 }
 0x270   :  { %v645_v7 = vsel %vm644_vm14, %v640_v4, inf  ;;  %vm630_vm15 = vcmp.eq.f32.partialorder %v2383_v23, %v2462_v47  ;;  %v537_v23 = vcvt.f32.s32 %v2419_v31  ;;  %v468_v31 = vshll.u32 %v467_v13, 16 }
 0x271   :  { %646 = vmin.xlane.f32.xlu1 %v645_v7  ;;  %v631_v37 = vsel %vm630_vm15, %v626_v3, inf  ;;  %v2485_v41 = vshll.u32 %v509_v17, 16  ;;  %v2507_v27 = vshll.u32 %v593_v15, 16  ;;  %v649_v25 = vcvt.f32.s32 %v2460_v38 }
 0x272   :  { %632 = vmin.xlane.f32.xlu0 %v631_v37  ;;  %v2489_v20 = vshll.u32 %v537_v23, 16  ;;  %v635_v62 = vcvt.f32.s32 %v2462_v47  ;;  %v698_v4 = vsub.s32 %v2499_v52, %v2479_v22  ;;  %v2525_v3 = vshll.u32 %v621_v51, 16 }
 0x273   :  { %v2527_v7 = vshll.u32 %v607_v28, 16  ;;  %v705_v38 = vsub.s32 %v2505_v53, %v2479_v22  ;;  %v2534_v47 = vshll.u32 %v649_v25, 16  ;;  %v712_v13 = vsub.s32 %v2519_v59, %v2479_v22 }
 0x274   :  { %v2539_v17 = vadd.s32 4294967240, %v2209_v10  ;;  %v2542_v57 = vshll.u32 %v635_v62, 16  ;;  %v2009_v52 = vmov 1.0   ;;  %vm721_vm15 = vcmask 392512  }
 0x275   :  { %v2577_v62 = vadd.s32 4294967232, %v2209_v10 }
 0x276   :  { %v733_v12 = vsub.s32 %v2539_v17, %v2479_v22 }
 0x2e2   :  { %v451_v33 = vpop.xlane.xlu1 %450 }
 0x2e3   :  { %v452_v61 = vcvt.f32.s32 %v451_v33  ;;  %v437_v35 = vpop.xlane.xlu0 %436 }
 0x2e4   :  { %v438_v37 = vcvt.f32.s32 %v437_v35 }
 0x2e5   :  { %v455_v5 = vadd.s32 %v454_v19, %v452_v61 }
 0x2e6   :  { %v441_v2 = vadd.s32 %v440_v14, %v438_v37  ;;  %v479_v44 = vpop.xlane.xlu1 %478 }
 0x2e7   :  { %v480_v23 = vcvt.f32.s32 %v479_v44  ;;  %v465_v43 = vpop.xlane.xlu0 %464  ;;  %v669_v46 = vsel %vm653_vm1, %v455_v5, 0 }
 0x2e8   :  { %v466_v19 = vcvt.f32.s32 %v465_v43  ;;  %v668_v39 = vsel %vm652_vm2, %v441_v2, 0  ;;  %v692_v49 = vrot.slane %v669_v46, %v691_v54  ;;  %vm898_vm10 = vcmp.eq.s32.totalorder %v2209_v10, %v669_v46 }
 0x2e9   :  { %v483_v14 = vadd.s32 %v482_v63, %v480_v23  ;;  %v687_v15 = vrot.slane %v668_v39, %v686_v60  ;;  %vm897_vm11 = vcmp.eq.s32.totalorder %v2209_v10, %v668_v39  ;;  %v2560_v63 = vadd.s32 4294967224, %v2209_v10 }
 0x2ea   :  { %v469_v8 = vadd.s32 %v468_v31, %v466_v19  ;;  %v507_v11 = vpop.xlane.xlu1 %506  ;;  %1637 = vmatprep.mubr.msk.f32.mxu1 %vm897_vm11, %v2009_v52  ;;  %vm1761_vm14 = vmpackc.low %vm898_vm10, %vm897_vm11  ;;  %v2010_v31 = vmov 1.0|1.0   ;;  %v726_v60 = vsub.s32 %v2547_v45, %v2479_v22  ;;  %vm660_vm11 = vcmp.lt.f32.partialorder %v2297_v42, inf }
 0x2eb   :  { %v508_v51 = vcvt.f32.s32 %v507_v11  ;;  %v694_v28 = vsel %vm693_vm4, %v692_v49, %v687_v15  ;;  %1638 = vmatmul.mubr.msk.f32.vlgmr.msra.gmra.mrb[0].mxu1 %vm898_vm10, %v2009_v52  ;;  %1762 = vmatpush3.bf16.msk.msra.mxu0 %vm1761_vm14, %v2010_v31  ;;  %v493_v54 = vpop.xlane.xlu0 %492  ;;  %v671_v53 = vsel %vm655_vm3, %v483_v14, 0  ;;  %vm728_vm3 = vcmask 458112  }
 0x2ec   :  { %v494_v25 = vcvt.f32.s32 %v493_v54  ;;  %v670_v33 = vsel %vm654_vm5, %v469_v8, 0  ;;  %1763 = vmatprep.subr.bf16.mxu0 %v2006_v36  ;;  %vm900_vm1 = vcmp.eq.s32.totalorder %v2209_v10, %v671_v53  ;;  %vm661_vm4 = vcmp.lt.f32.partialorder %v2291_v40, inf }
 0x2ed   :  { %v511_v61 = vadd.s32 %v2485_v41, %v508_v51  ;;  %v699_v35 = vrot.slane %v670_v33, %v698_v4  ;;  %vm899_vm2 = vcmp.eq.s32.totalorder %v2209_v10, %v670_v33  ;;  %v706_v18 = vrot.slane %v671_v53, %v705_v38 }
 0x2ee   :  { %v497_v16 = vadd.s32 %v2487_v9, %v494_v25  ;;  %v535_v37 = vpop.xlane.xlu1 %534  ;;  %1640 = vmatprep.mubr.msk.f32.mxu1 %vm899_vm2, %v2009_v52  ;;  %vm1764_vm5 = vmpackc.low %vm900_vm1, %vm899_vm2  ;;  %vm735_vm10 = vcmask 523712   ;;  %v747_v5 = vsub.s32 %v2560_v63, %v2479_v22  ;;  %v2597_v2 = vadd.s32 4294967208, %v2209_v10 }
 0x2ef   :  { %v536_v41 = vcvt.f32.s32 %v535_v37  ;;  %v701_v4 = vsel %vm700_vm6, %v699_v35, %v694_v28  ;;  %1641 = vmatmul.mubr.msk.f32.gmra.mrb[2].mxu1 %vm900_vm1, %v2009_v52  ;;  %1765 = vmatpush3.bf16.msk.msra.mxu0 %vm1764_vm5, %v2010_v31  ;;  %v521_v9 = vpop.xlane.xlu0 %520  ;;  %v673_v38 = vsel %vm657_vm8, %v511_v61, 0  ;;  %v740_v46 = vsub.s32 %v2577_v62, %v2479_v22 }
 0x2f0   :  { %v708_v44 = vsel %vm707_vm7, %v706_v18, %v701_v4  ;;  %v522_v23 = vcvt.f32.s32 %v521_v9  ;;  %v672_v43 = vsel %vm656_vm9, %v497_v16, 0  ;;  %1766 = vmatprep.subr.bf16.mxu0 %v2006_v36  ;;  %vm902_vm8 = vcmp.eq.s32.totalorder %v2209_v10, %v673_v38 }
 0x2f1   :  { %v539_v45 = vadd.s32 %v2489_v20, %v536_v41  ;;  %v713_v24 = vrot.slane %v672_v43, %v712_v13  ;;  %vm901_vm6 = vcmp.eq.s32.totalorder %v2209_v10, %v672_v43  ;;  %vm663_vm7 = vcmp.lt.f32.partialorder %v2313_v48, inf }
 0x2f2   :  { %v525_v26 = vadd.s32 %v2492_v1, %v522_v23  ;;  %v563_v19 = vpop.xlane.xlu1 %562  ;;  %1643 = vmatprep.mubr.msk.f32.mxu1 %vm901_vm6, %v2009_v52  ;;  %v720_v39 = vrot.slane %v673_v38, %v719_v55  ;;  %vm1767_vm9 = vmpackc.low %vm902_vm8, %vm901_vm6  ;;  %vm742_vm14 = vcmask 589312   ;;  %v2618_v20 = vadd.s32 4294967216, %v2209_v10 }
 0x2f3   :  { %vm662_vm1 = vcmp.lt.f32.partialorder %v2319_v50, inf  ;;  %v564_v59 = vcvt.f32.s32 %v563_v19  ;;  %v715_v13 = vsel %vm714_vm12, %v713_v24, %v708_v44  ;;  %1644 = vmatmul.mubr.msk.f32.gmra.mrb[4].mxu1 %vm902_vm8, %v2009_v52  ;;  %1768 = vmatpush3.bf16.msk.msra.mxu0 %vm1767_vm9, %v2010_v31  ;;  %v549_v1 = vpop.xlane.xlu0 %548  ;;  %v675_v49 = vsel %vm659_vm13, %v539_v45, 0 }
 0x2f4   :  { %v761_v29 = vsub.s32 %v2597_v2, %v2479_v22  ;;  %v722_v55 = vsel %vm721_vm15, %v720_v39, %v715_v13  ;;  %v550_v14 = vcvt.f32.s32 %v549_v1  ;;  %v674_v15 = vsel %vm658_vm0, %v525_v26, 0  ;;  %1769 = vmatprep.subr.bf16.mxu0 %v2006_v36  ;;  %v2801_v13 = vld [vmem:[#allocation20_spill] sm:$0xff] }
 0x2f5   :  { %vm749_vm12 = vcmask 654912   ;;  %v567_v8 = vadd.s32 %v2494_v21, %v564_v59  ;;  %v727_v11 = vrot.slane %v674_v15, %v726_v60  ;;  %vm903_vm2 = vcmp.eq.s32.totalorder %v2209_v10, %v674_v15  ;;  %v1799_v15 = vld [vmem:[#allocation2 + $0x8] sm:$0xff] }
 0x2f6   :  { %vm904_vm5 = vcmp.eq.s32.totalorder %v2209_v10, %v675_v49  ;;  %vm665_vm13 = vcmp.lt.f32.partialorder %v2335_v56, inf  ;;  %v553_v32 = vadd.s32 %v2496_v6, %v550_v14  ;;  %v591_v51 = vpop.xlane.xlu1 %590  ;;  %1646 = vmatprep.mubr.msk.f32.mxu1 %vm903_vm2, %v2009_v52  ;;  %v734_v34 = vrot.slane %v675_v49, %v733_v12 }
 0x2f7   :  { %vm1770_vm15 = vmpackc.low %vm904_vm5, %vm903_vm2  ;;  %v754_v21 = vsub.s32 %v2618_v20, %v2479_v22  ;;  %v2644_v28 = vadd.s32 4294967192, %v2209_v10  ;;  %vm664_vm0 = vcmp.lt.f32.partialorder %v2341_v58, inf  ;;  %v592_v54 = vcvt.f32.s32 %v591_v51  ;;  %1647 = vmatmul.mubr.msk.f32.gmra.mrb[6].mxu1 %vm904_vm5, %v2009_v52  ;;  %v577_v6 = vpop.xlane.xlu0 %576 }
 0x2f8   :  { %v729_v53 = vsel %vm728_vm3, %v727_v11, %v722_v55  ;;  %1771 = vmatpush3.bf16.msk.msra.mxu0 %vm1770_vm15, %v2010_v31  ;;  %v677_v17 = vsel %vm661_vm4, %v567_v8, 0  ;;  %v765_v12 = vadd.s32 4294967200, %v2209_v10  ;;  %v578_v25 = vcvt.f32.s32 %v577_v6 }
 0x2f9   :  { %v736_v60 = vsel %vm735_vm10, %v734_v34, %v729_v53  ;;  %v676_v33 = vsel %vm660_vm11, %v553_v32, 0  ;;  %1772 = vmatprep.subr.bf16.mxu0 %v2006_v36  ;;  %vm756_vm6 = vcmask 720512   ;;  %v595_v62 = vadd.s32 %v2507_v27, %v592_v54  ;;  %v1800_v32 = vld [vmem:[#allocation2] sm:$0xff] }
 0x2fa   :  { %v741_v61 = vrot.slane %v676_v33, %v740_v46  ;;  %vm905_vm3 = vcmp.eq.s32.totalorder %v2209_v10, %v676_v33  ;;  %vm906_vm8 = vcmp.eq.s32.totalorder %v2209_v10, %v677_v17  ;;  %v581_v40 = vadd.s32 %v2509_v30, %v578_v25  ;;  %v619_v35 = vpop.xlane.xlu1 %618 }
 0x2fb   :  { %1649 = vmatprep.mubr.msk.f32.mxu1 %vm905_vm3, %v2009_v52  ;;  %v748_v42 = vrot.slane %v677_v17, %v747_v5  ;;  %vm1773_vm4 = vmpackc.low %vm906_vm8, %vm905_vm3  ;;  %vm763_vm10 = vcmask 786112   ;;  %v775_v16 = vsub.s32 %v2644_v28, %v2479_v22  ;;  %v620_v27 = vcvt.f32.s32 %v619_v35  ;;  %v605_v30 = vpop.xlane.xlu0 %604 }
 0x2fc   :  { %v743_v37 = vsel %vm742_vm14, %v741_v61, %v736_v60  ;;  %1650 = vmatmul.mubr.msk.f32.gmra.mrb[8].mxu1 %vm906_vm8, %v2009_v52  ;;  %1774 = vmatpush3.bf16.msk.msra.mxu0 %vm1773_vm4, %v2010_v31  ;;  %v679_v18 = vsel %vm663_vm7, %v595_v62, 0  ;;  %v779_v41 = vadd.s32 4294967184, %v2209_v10  ;;  %v606_v5 = vcvt.f32.s32 %v605_v30  ;;  %v1803_v60 = vld [vmem:[#allocation2 + $0x28] sm:$0xff]  ;;  %v1804_v62 = vld [vmem:[#allocation2 + $0x20] sm:$0xff] }
 0x2fd   :  { %v750_v63 = vsel %vm749_vm12, %v748_v42, %v743_v37  ;;  %v678_v4 = vsel %vm662_vm1, %v581_v40, 0  ;;  %1775 = vmatprep.subr.bf16.mxu0 %v2006_v36  ;;  %v768_v9 = vsub.s32 %v765_v12, %v2479_v22  ;;  %v623_v38 = vadd.s32 %v2525_v3, %v620_v27  ;;  %v1805_v27 = vld [vmem:[#allocation2 + $0x38] sm:$0xff] }
 0x2fe   :  { %v755_v2 = vrot.slane %v678_v4, %v754_v21  ;;  %vm907_vm11 = vcmp.eq.s32.totalorder %v2209_v10, %v678_v4  ;;  %vm908_vm9 = vcmp.eq.s32.totalorder %v2209_v10, %v679_v18  ;;  %v609_v48 = vadd.s32 %v2527_v7, %v606_v5  ;;  %v647_v44 = vpop.xlane.xlu1 %646 }
 0x2ff   :  { %1652 = vmatprep.mubr.msk.f32.mxu1 %vm907_vm11, %v2009_v52  ;;  %v762_v23 = vrot.slane %v679_v18, %v761_v29  ;;  %vm1776_vm7 = vmpackc.low %vm908_vm9, %vm907_vm11  ;;  %v786_v50 = vadd.s32 4294967176, %v2209_v10  ;;  %vm770_vm14 = vcmask 851712   ;;  %v648_v43 = vcvt.f32.s32 %v647_v44  ;;  %v633_v3 = vpop.xlane.xlu0 %632 }
 0x300   :  { %v757_v46 = vsel %vm756_vm6, %v755_v2, %v750_v63  ;;  %1653 = vmatmul.mubr.msk.f32.gmra.mrb[10].mxu1 %vm908_vm9, %v2009_v52  ;;  %1777 = vmatpush3.bf16.msk.msra.mxu0 %vm1776_vm7, %v2010_v31  ;;  %v681_v45 = vsel %vm665_vm13, %v623_v38, 0  ;;  %v782_v7 = vsub.s32 %v779_v41, %v2479_v22  ;;  %v634_v26 = vcvt.f32.s32 %v633_v3  ;;  %v1806_v41 = vld [vmem:[#allocation2 + $0x30] sm:$0xff]  ;;  %v1807_v2 = vld [vmem:[#allocation2 + $0x48] sm:$0xff] }
 0x301   :  { %v764_v24 = vsel %vm763_vm10, %v762_v23, %v757_v46  ;;  %v680_v19 = vsel %vm664_vm0, %v609_v48, 0  ;;  %1778 = vmatprep.subr.bf16.mxu0 %v2006_v36  ;;  %vm777_vm1 = vcmask 917312   ;;  %v651_v39 = vadd.s32 %v2534_v47, %v648_v43 }
 0x302   :  { %v769_v20 = vrot.slane %v680_v19, %v768_v9  ;;  %vm909_vm12 = vcmp.eq.s32.totalorder %v2209_v10, %v680_v19  ;;  %vm910_vm2 = vcmp.eq.s32.totalorder %v2209_v10, %v681_v45  ;;  %vm667_vm5 = vcmp.lt.f32.partialorder %v2357_v0, inf }
 0x303   :  { %v637_v56 = vadd.s32 %v2542_v57, %v634_v26  ;;  %1655 = vmatprep.mubr.msk.f32.mxu1 %vm909_vm12, %v2009_v52  ;;  %v776_v59 = vrot.slane %v681_v45, %v775_v16  ;;  %vm1779_vm13 = vmpackc.low %vm910_vm2, %vm909_vm12  ;;  %v789_v58 = vsub.s32 %v786_v50, %v2479_v22  ;;  %vm666_vm15 = vcmp.lt.f32.partialorder %v2801_v13, inf  ;;  %v1808_v50 = vld [vmem:[#allocation2 + $0x40] sm:$0xff] }
 0x304   :  { %1656 = vmatmul.mubr.msk.f32.gmra.mrb[12].mxu1 %vm910_vm2, %v2009_v52  ;;  %1780 = vmatpush3.bf16.msk.msra.mxu0 %vm1779_vm13, %v2010_v31  ;;  %v683_v47 = vsel %vm667_vm5, %v651_v39, 0  ;;  %v771_v1 = vsel %vm770_vm14, %v769_v20, %v764_v24  ;;  %vm784_vm6 = vcmask 982912   ;;  %vm791_vm8 = vcmask 1048512   ;;  %v1809_v24 = vld [vmem:[#allocation2 + $0x58] sm:$0xff]  ;;  %v1810_v20 = vld [vmem:[#allocation2 + $0x50] sm:$0xff] }
 0x305   :  { %v682_v49 = vsel %vm666_vm15, %v637_v56, 0  ;;  %1781 = vmatprep.subr.bf16.mxu0 %v2006_v36  ;;  %vm912_vm0 = vcmp.eq.s32.totalorder %v2209_v10, %v683_v47  ;;  %v778_v0 = vsel %vm777_vm1, %v776_v59, %v771_v1  ;;  %v790_v22 = vrot.slane %v683_v47, %v789_v58  ;;  %v1811_v1 = vld [vmem:[#allocation2 + $0x68] sm:$0xff] }
 0x306   :  { %v783_v57 = vrot.slane %v682_v49, %v782_v7  ;;  %vm911_vm3 = vcmp.eq.s32.totalorder %v2209_v10, %v682_v49  ;;  %vm797_vm10 = vcmp.lt.s32.totalorder %v2209_v10, 32  ;;  %v1801_v10 = vld [vmem:[#allocation2 + $0x18] sm:$0xff] }
 0x307   :  { %1658 = vmatprep.mubr.msk.f32.mxu1 %vm911_vm3, %v2009_v52  ;;  %vm1782_vm4 = vmpackc.low %vm912_vm0, %vm911_vm3 }
 0x308   :  { %1659 = vmatmul.mubr.msk.f32.gmra.mrb[14].mxu1 %vm912_vm0, %v2009_v52  ;;  %1783 = vmatpush3.bf16.msk.msra.mxu0 %vm1782_vm4, %v2010_v31  ;;  %v785_v36 = vsel %vm784_vm6, %v783_v57, %v778_v0 }
 0x309   :  { %v792_v29 = vsel %vm791_vm8, %v790_v22, %v785_v36  ;;  %v1812_v22 = vld [vmem:[#allocation2 + $0x60] sm:$0xff] }
 0x30a   :  { %793 = vst [vmem:[#allocation9] sm:$0x1] %v792_v29 }
 0x30b   :  { %1694 = vmatmul.mubr.msk.f32.vlgmr.msra.gmra.mrb[16].mxu0 %vm797_vm10, %v2009_v52  ;;  %v1802_v52 = vld [vmem:[#allocation2 + $0x10] sm:$0xff] }
 0x3be   :  { %v1639_v55 = vpop.f32.mrb[0].mxu1 }
 0x3bf   :  { %v1043_v14 = vpop.f32.mrb[1].mxu1  ;;  %1139 = vst [vmem:[#allocation11 + $0x8] sm:$0xff] %v1639_v55  ;;  %v1242_v8 = vsub.f32 %v1639_v55, %v1799_v15 }
 0x3c0   :  { %1138 = vst [vmem:[#allocation11] sm:$0xff] %v1043_v14  ;;  %v1241_v51 = vsub.f32 %v1043_v14, %v1800_v32 }
 0x3c1   :  { %v1258_v21 = vmul.f32 %v1242_v8, %v1242_v8  ;;  %v1813_v8 = vld [vmem:[#allocation2 + $0x78] sm:$0xff] }
 0x3c2   :  { %v1642_v11 = vpop.f32.mrb[2].mxu1  ;;  %v1257_v28 = vmul.f32 %v1241_v51, %v1241_v51  ;;  %v1814_v51 = vld [vmem:[#allocation2 + $0x70] sm:$0xff] }
 0x3c3   :  { %v1053_v34 = vpop.f32.mrb[3].mxu1  ;;  %1141 = vst [vmem:[#allocation11 + $0x18] sm:$0xff] %v1642_v11  ;;  %1291 = vadd.xlane.f32.xlu1 %v1258_v21  ;;  %v1244_v31 = vsub.f32 %v1642_v11, %v1801_v10 }
 0x3c4   :  { %1140 = vst [vmem:[#allocation11 + $0x10] sm:$0xff] %v1053_v34  ;;  %1289 = vadd.xlane.f32.xlu0 %v1257_v28  ;;  %v1243_v53 = vsub.f32 %v1053_v34, %v1802_v52 }
 0x3c5   :  { %v1260_v17 = vmul.f32 %v1244_v31, %v1244_v31 }
 0x3c6   :  { %v1645_v54 = vpop.f32.mrb[4].mxu1  ;;  %v1259_v12 = vmul.f32 %v1243_v53, %v1243_v53 }
 0x3c7   :  { %v1063_v6 = vpop.f32.mrb[5].mxu1  ;;  %1143 = vst [vmem:[#allocation11 + $0x28] sm:$0xff] %v1645_v54  ;;  %1295 = vadd.xlane.f32.xlu1 %v1260_v17  ;;  %v1246_v25 = vsub.f32 %v1645_v54, %v1803_v60 }
 0x3c8   :  { %1142 = vst [vmem:[#allocation11 + $0x20] sm:$0xff] %v1063_v6  ;;  %1293 = vadd.xlane.f32.xlu0 %v1259_v12  ;;  %v1245_v61 = vsub.f32 %v1063_v6, %v1804_v62 }
 0x3c9   :  { %v1262_v35 = vmul.f32 %v1246_v25, %v1246_v25 }
 0x3ca   :  { %v1648_v33 = vpop.f32.mrb[6].mxu1  ;;  %v1261_v42 = vmul.f32 %v1245_v61, %v1245_v61 }
 0x3cb   :  { %v1073_v40 = vpop.f32.mrb[7].mxu1  ;;  %1145 = vst [vmem:[#allocation11 + $0x38] sm:$0xff] %v1648_v33  ;;  %v1278_v16 = vmul.f32 0.0, %v1262_v35  ;;  %v1248_v37 = vsub.f32 %v1648_v33, %v1805_v27 }
 0x3cc   :  { %1144 = vst [vmem:[#allocation11 + $0x30] sm:$0xff] %v1073_v40  ;;  %v1277_v18 = vmul.f32 0.0, %v1261_v42  ;;  %v1247_v63 = vsub.f32 %v1073_v40, %v1806_v41 }
 0x3cd   :  { %1299 = vadd.xlane.f32.xlu1 %v1278_v16  ;;  %v1264_v4 = vmul.f32 %v1248_v37, %v1248_v37 }
 0x3ce   :  { %1297 = vadd.xlane.f32.xlu0 %v1277_v18  ;;  %v1263_v9 = vmul.f32 %v1247_v63, %v1247_v63 }
 0x3cf   :  { %v1651_v30 = vpop.f32.mrb[8].mxu1  ;;  %v1280_v38 = vmul.f32 0.0, %v1264_v4 }
 0x3d0   :  { %v1083_v5 = vpop.f32.mrb[9].mxu1  ;;  %1147 = vst [vmem:[#allocation11 + $0x48] sm:$0xff] %v1651_v30  ;;  %v1250_v48 = vsub.f32 %v1651_v30, %v1807_v2  ;;  %v1279_v23 = vmul.f32 0.0, %v1263_v9 }
 0x3d1   :  { %1146 = vst [vmem:[#allocation11 + $0x40] sm:$0xff] %v1083_v5  ;;  %v1249_v43 = vsub.f32 %v1083_v5, %v1808_v50  ;;  %1303 = vadd.xlane.f32.xlu1 %v1280_v38 }
 0x3d2   :  { %v1266_v3 = vmul.f32 %v1250_v48, %v1250_v48  ;;  %1301 = vadd.xlane.f32.xlu0 %v1279_v23 }
 0x3d3   :  { %v1654_v44 = vpop.f32.mrb[10].mxu1  ;;  %v1265_v45 = vmul.f32 %v1249_v43, %v1249_v43 }
 0x3d4   :  { %v1093_v46 = vpop.f32.mrb[11].mxu1  ;;  %1149 = vst [vmem:[#allocation11 + $0x58] sm:$0xff] %v1654_v44  ;;  %v1282_v7 = vmul.f32 0.0, %v1266_v3  ;;  %v1252_v26 = vsub.f32 %v1654_v44, %v1809_v24 }
 0x3d5   :  { %1148 = vst [vmem:[#allocation11 + $0x50] sm:$0xff] %v1093_v46  ;;  %v1281_v39 = vmul.f32 0.0, %v1265_v45  ;;  %v1251_v56 = vsub.f32 %v1093_v46, %v1810_v20 }
 0x3d6   :  { %1307 = vadd.xlane.f32.xlu1 %v1282_v7  ;;  %v1268_v58 = vmul.f32 %v1252_v26, %v1252_v26 }
 0x3d7   :  { %v1657_v19 = vpop.f32.mrb[12].mxu1  ;;  %1305 = vadd.xlane.f32.xlu0 %v1281_v39  ;;  %v1267_v13 = vmul.f32 %v1251_v56, %v1251_v56 }
 0x3d8   :  { %v1103_v59 = vpop.f32.mrb[13].mxu1  ;;  %1151 = vst [vmem:[#allocation11 + $0x68] sm:$0xff] %v1657_v19  ;;  %v1284_v47 = vmul.f32 0.0, %v1268_v58  ;;  %v1254_v49 = vsub.f32 %v1657_v19, %v1811_v1 }
 0x3d9   :  { %1150 = vst [vmem:[#allocation11 + $0x60] sm:$0xff] %v1103_v59  ;;  %v1283_v57 = vmul.f32 0.0, %v1267_v13  ;;  %v1253_v36 = vsub.f32 %v1103_v59, %v1812_v22 }
 0x3da   :  { %1311 = vadd.xlane.f32.xlu1 %v1284_v47  ;;  %v1270_v55 = vmul.f32 %v1254_v49, %v1254_v49 }
 0x3db   :  { %v1660_v0 = vpop.f32.mrb[14].mxu1  ;;  %1309 = vadd.xlane.f32.xlu0 %v1283_v57  ;;  %v1269_v14 = vmul.f32 %v1253_v36, %v1253_v36 }
 0x3dc   :  { %v1113_v29 = vpop.f32.mrb[15].mxu1  ;;  %1153 = vst [vmem:[#allocation11 + $0x78] sm:$0xff] %v1660_v0  ;;  %v1286_v15 = vmul.f32 0.0, %v1270_v55  ;;  %v1256_v11 = vsub.f32 %v1660_v0, %v1813_v8 }
 0x3dd   :  { %1152 = vst [vmem:[#allocation11 + $0x70] sm:$0xff] %v1113_v29  ;;  %v1285_v32 = vmul.f32 0.0, %v1269_v14  ;;  %v1255_v34 = vsub.f32 %v1113_v29, %v1814_v51 }
 0x3de   :  { %1315 = vadd.xlane.f32.xlu1 %v1286_v15  ;;  %v1272_v21 = vmul.f32 %v1256_v11, %v1256_v11  ;;  %v1220_v54 = vpop.f32.mrb[16].mxu0 }
 0x3df   :  { %1313 = vadd.xlane.f32.xlu0 %v1285_v32  ;;  %v1271_v28 = vmul.f32 %v1255_v34, %v1255_v34  ;;  %1224 = vst [vmem:[#allocation14] sm:$0x1] %v1220_v54  ;;  %v1695_v52 = vpop.f32.mrb[17].mxu0 }
 0x3e0   :  { %v1288_v10 = vmul.f32 0.0, %v1272_v21 }
 0x3e1   :  { %v1287_v31 = vmul.f32 0.0, %v1271_v28 }
 0x3e2   :  { %1319 = vadd.xlane.f32.xlu1 %v1288_v10 }
 0x3e3   :  { %1317 = vadd.xlane.f32.xlu0 %v1287_v31 }
 0x3e4   :  { %1892 = shalt.err (!%p1889_p0)
}
 0x3e5   :  { %s1893_s27 = scalar_lea.hbm %s2793_s5, 16 }
 0x3e6   :  { %p1894_p1 = scmp.ne.s32.totalorder %s2793_s5, %s1893_s27  ;;  %p1897_p2 = scmp.lt.u32.totalorder %s1893_s27, %s2793_s5 }
 0x3e8   :  { %p1899_p3 = pnand %p1897_p2, %p1894_p1 }
 0x3ea   :  { %1902 = shalt.err (!%p1899_p3)
}
 0x3eb   :  { %1364 = dma.vmem_to_hbm [thread:$0]  %s1362_s22, 16, %s2793_s5, [#allocation10]  }
 0x3ec   :  { %s2012_s12 = smov [#allocation8]  }
 0x3ed   :  { %s1348_s13 = sshll.u32 %s2012_s12, 4  ;;  %s1349_s13 = int_to_ptr.vmem [resolvable:$true] %s1348_s13 }
 0x3ee   :  { %s1903_s14 = scalar_lea.vmem %s1349_s13, 2048  ;;  %p1908_p5 = scmp.lt.s32.totalorder %s1349_s13, %s1349_s13 }
 0x3ef   :  { %p1904_p4 = scmp.ne.s32.totalorder %s1349_s13, %s1903_s14  ;;  %p1909_p6 = scmp.lt.s32.totalorder %s1903_s14, %s1903_s14 }
 0x3f1   :  { %p1910_p7 = por %p1909_p6, %p1908_p5 }
 0x3f3   :  { %p1911_p8 = pnand %p1910_p7, %p1904_p4 }
 0x3f5   :  { %1914 = shalt.err (!%p1911_p8)
}
 0x3f6   :  { %s1915_s19 = scalar_lea.hbm %s2792_s4, 2048 }
 0x3f7   :  { %p1916_p9 = scmp.ne.s32.totalorder %s2792_s4, %s1915_s19  ;;  %p1919_p10 = scmp.lt.u32.totalorder %s1915_s19, %s2792_s4 }
 0x3f9   :  { %p1921_p11 = pnand %p1919_p10, %p1916_p9 }
 0x3fb   :  { %1924 = shalt.err (!%p1921_p11)
}
 0x3fc   :  { %1354 = dma.vmem_to_hbm [thread:$0]  %s1349_s13, 2048, %s2792_s4, [#allocation4], %s2003_s17, %s2003_s17, %s2004_s18  }
 0x3fd   :  { %s2013_s3 = smov [#allocation11]  }
 0x3fe   :  { %s1370_s22 = sshll.u32 %s2013_s3, 4  ;;  %s1371_s22 = int_to_ptr.vmem [resolvable:$true] %s1370_s22 }
 0x3ff   :  { %s1925_s23 = scalar_lea.vmem %s1371_s22, 2048  ;;  %p1930_p13 = scmp.lt.s32.totalorder %s1371_s22, %s1371_s22 }
 0x400   :  { %p1926_p12 = scmp.ne.s32.totalorder %s1371_s22, %s1925_s23  ;;  %p1931_p0 = scmp.lt.s32.totalorder %s1925_s23, %s1925_s23 }
 0x402   :  { %p1932_p1 = por %p1931_p0, %p1930_p13 }
 0x404   :  { %p1933_p2 = pnand %p1932_p1, %p1926_p12 }
 0x406   :  { %1936 = shalt.err (!%p1933_p2)
}
 0x407   :  { %s1937_s26 = scalar_lea.hbm %s2794_s6, 2048 }
 0x408   :  { %p1938_p3 = scmp.ne.s32.totalorder %s2794_s6, %s1937_s26  ;;  %p1941_p4 = scmp.lt.u32.totalorder %s1937_s26, %s2794_s6 }
 0x40a   :  { %p1943_p5 = pnand %p1941_p4, %p1938_p3 }
 0x40c   :  { %1946 = shalt.err (!%p1943_p5)
}
 0x40d   :  { %1376 = dma.vmem_to_hbm [thread:$0]  %s1371_s22, 2048, %s2794_s6, [#allocation10], %s2003_s17, %s2003_s17, %s2004_s18  }
 0x40e   :  { %s2014_s6 = smov [#allocation12]   ;;  %s2015_s18 = smov [#allocation14]  }
 0x40f   :  { %s1383_s17 = sshll.u32 %s2014_s6, 4  ;;  %s1393_s10 = sshll.u32 %s2015_s18, 4  ;;  %s1384_s17 = int_to_ptr.vmem [resolvable:$true] %s1383_s17  ;;  %s2756_s10 = int_to_ptr.vmem [resolvable:$true] %s1393_s10 }
 0x410   :  { %s1947_s11 = scalar_lea.vmem %s1384_s17, 16  ;;  %s1951_s12 = scalar_lea.vmem %s1384_s17, 32 }
 0x411   :  { %p1948_p6 = scmp.ne.s32.totalorder %s1384_s17, %s1947_s11  ;;  %p1952_p7 = scmp.lt.s32.totalorder %s1384_s17, %s1384_s17 }
 0x412   :  { %p1953_p8 = scmp.lt.s32.totalorder %s1951_s12, %s1947_s11 }
 0x414   :  { %p1954_p9 = por %p1953_p8, %p1952_p7 }
 0x416   :  { %p1955_p10 = pnand %p1954_p9, %p1948_p6 }
 0x450   :  { %v1292_v53 = vpop.xlane.xlu1 %1291 }
 0x451   :  { %v1290_v6 = vpop.xlane.xlu0 %1289 }
 0x452   :  { %v1321_v17 = vadd.f32 %v1292_v53, %v1290_v6 }
 0x454   :  { %v1296_v60 = vpop.xlane.xlu1 %1295 }
 0x455   :  { %v1294_v12 = vpop.xlane.xlu0 %1293 }
 0x456   :  { %v1322_v25 = vadd.f32 %v1321_v17, %v1294_v12 }
 0x458   :  { %v1323_v62 = vadd.f32 %v1322_v25, %v1296_v60 }
 0x45a   :  { %v1300_v33 = vpop.xlane.xlu1 %1299 }
 0x45b   :  { %v1298_v61 = vpop.xlane.xlu0 %1297 }
 0x45c   :  { %v1324_v40 = vadd.f32 %v1323_v62, %v1298_v61 }
 0x45e   :  { %v1304_v35 = vpop.xlane.xlu1 %1303  ;;  %v1325_v42 = vadd.f32 %v1324_v40, %v1300_v33 }
 0x45f   :  { %v1302_v16 = vpop.xlane.xlu0 %1301 }
 0x460   :  { %v1326_v27 = vadd.f32 %v1325_v42, %v1302_v16 }
 0x462   :  { %v1327_v30 = vadd.f32 %v1326_v27, %v1304_v35 }
 0x463   :  { %v1308_v37 = vpop.xlane.xlu1 %1307 }
 0x464   :  { %v1306_v18 = vpop.xlane.xlu0 %1305 }
 0x465   :  { %v1328_v41 = vadd.f32 %v1327_v30, %v1306_v18 }
 0x467   :  { %v1312_v63 = vpop.xlane.xlu1 %1311  ;;  %v1329_v5 = vadd.f32 %v1328_v41, %v1308_v37 }
 0x468   :  { %v1310_v4 = vpop.xlane.xlu0 %1309 }
 0x469   :  { %v1330_v9 = vadd.f32 %v1329_v5, %v1310_v4 }
 0x46b   :  { %v1331_v38 = vadd.f32 %v1330_v9, %v1312_v63  ;;  %v1316_v2 = vpop.xlane.xlu1 %1315 }
 0x46c   :  { %v1314_v48 = vpop.xlane.xlu0 %1313 }
 0x46d   :  { %v1332_v44 = vadd.f32 %v1331_v38, %v1314_v48 }
 0x46f   :  { %v1333_v23 = vadd.f32 %v1332_v44, %v1316_v2  ;;  %v1320_v46 = vpop.xlane.xlu1 %1319 }
 0x470   :  { %v1318_v50 = vpop.xlane.xlu0 %1317 }
 0x471   :  { %v1334_v43 = vadd.f32 %v1333_v23, %v1318_v50 }
 0x473   :  { %v1335_v3 = vadd.f32 %v1334_v43, %v1320_v46 }
 0x475   :  { %v1336_v45 = vrot.slane %v1335_v3, 4 }
 0x477   :  { %v1337_v7 = vadd.f32 %v1336_v45, %v1335_v3 }
 0x479   :  { %v1338_v24 = vrot.slane %v1337_v7, 2 }
 0x47b   :  { %v1339_v26 = vadd.f32 %v1338_v24, %v1337_v7 }
 0x47d   :  { %v1340_v19 = vrot.slane %v1339_v26, 1 }
 0x47f   :  { %v1341_v39 = vadd.f32 %v1340_v19, %v1339_v26 }
 0x481   :  { %1342 = vst [vmem:[#allocation12] sm:$0x1] %v1341_v39 }
 0x482   :  { %1958 = shalt.err (!%p1955_p10)
}
 0x483   :  { %s1959_s15 = scalar_lea.hbm %s2795_s7, 16 }
 0x484   :  { %p1960_p11 = scmp.ne.s32.totalorder %s2795_s7, %s1959_s15  ;;  %p1963_p12 = scmp.lt.u32.totalorder %s1959_s15, %s2795_s7 }
 0x486   :  { %p1965_p13 = pnand %p1963_p12, %p1960_p11 }
 0x488   :  { %1968 = shalt.err (!%p1965_p13)
}
 0x489   :  { %1386 = dma.vmem_to_hbm [thread:$0]  %s1384_s17, 16, %s2795_s7, [#allocation13]  }
 0x48a   :  { %s1969_s2 = scalar_lea.vmem %s2756_s10, 16  ;;  %s1973_s21 = scalar_lea.vmem %s2756_s10, 32 }
 0x48b   :  { %p1970_p0 = scmp.ne.s32.totalorder %s2756_s10, %s1969_s2  ;;  %p1974_p1 = scmp.lt.s32.totalorder %s2756_s10, %s2756_s10 }
 0x48c   :  { %p1975_p2 = scmp.lt.s32.totalorder %s1973_s21, %s1969_s2 }
 0x48e   :  { %p1976_p3 = por %p1975_p2, %p1974_p1 }
 0x490   :  { %p1977_p4 = pnand %p1976_p3, %p1970_p0 }
 0x492   :  { %1980 = shalt.err (!%p1977_p4)
}
 0x493   :  { %s1981_s23 = scalar_lea.hbm %s2796_s8, 16 }
 0x494   :  { %p1982_p5 = scmp.ne.s32.totalorder %s2796_s8, %s1981_s23  ;;  %p1985_p6 = scmp.lt.u32.totalorder %s1981_s23, %s2796_s8 }
 0x496   :  { %p1987_p7 = pnand %p1985_p6, %p1982_p5 }
 0x498   :  { %1990 = shalt.err (!%p1987_p7)
}
 0x499   :  { %1396 = dma.vmem_to_hbm [thread:$0]  %s2756_s10, 16, %s2796_s8, [#allocation13]  }
 0x49a   :  { %1995 = dma.done.wait [#allocation4], 2048  }
 0x49b   :  { %1996 = vsyncadd [#allocation4], 4294965248 }
 0x49c   :  { %1997 = dma.done.wait [#allocation10], 2064  }
 0x49d   :  { %1998 = vsyncadd [#allocation10], 4294965232 }
 0x49e   :  { %1999 = dma.done.wait [#allocation13], 32  }
 0x49f   :  { %2000 = vsyncadd [#allocation13], 4294967264 }
 0x4a0   :  { %1412 = vsyncpa [#allocation3], 1 }
 0x4a1   :  { %1413 = vsyncpa [#allocation6], 1 }
 0x4a2   :  { %1414 = vsyncpa [#allocation4], 1 }
 0x4a3   :  { %1415 = vsyncpa [#allocation10], 1 }
 0x4a4   :  { %1416 = vsyncpa [#allocation13], 1 }

</bundles_post_ra>
